<compile_context>
chip_gen: v7x
topology: tpu7x:2x2x1
jax: 0.10.0
libtpu: 0.0.40
codegen_flags: <defaults>
</compile_context>

<pallas_src>
import functools
from types import SimpleNamespace

import jax
import jax.numpy as jnp
from jax.experimental import pallas as pl
from jax.experimental.pallas import tpu as pltpu

_NEG = -1e30     # column padding: softmax weight underflows to exactly 0
_CEPS = 1e-7     # cosine_similarity_loss eps (reference default argument)


def _softmax_and_log(x):
    """Softmax + log-softmax in one pass (1 exp/elem, exact denominator)."""
    m = jnp.max(x, axis=-1, keepdims=True)
    xs = x - m
    e = jnp.exp(xs)
    s = jnp.sum(e, axis=-1, keepdims=True)
    return e / s, xs - jnp.log(s)


def _entloss_kernel(f1_ref, f2_ref, o_all_ref, t_all_ref,   # inputs
                    part_ref, sp1_ref, sp2_ref,             # outputs
                    *, tau, tm, n_rows, n_pad, d_pad):
    i = pl.program_id(0)
    row0 = pl.multiple_of(i * tm, tm)

    # Row validity mask: padded rows contribute nothing to any sum.
    rids = row0 + jax.lax.broadcasted_iota(jnp.int32, (tm, 1), 0)
    rmask = (rids < n_rows).astype(jnp.float32)

    f1 = f1_ref[...]
    f2 = f2_ref[...]

    # ---------- softmax + log-softmax, folded symmetric KL ----------
    # KL(p1||p2)+KL(p2||p1) = sum((p1-p2)*(logp1-logp2)); log-softmax replaces
    # log(p + EPS) -> O(EPS) deviation from the reference.
    p1, lp1 = _softmax_and_log(f1)
    p2, lp2 = _softmax_and_log(f2)
    kl_blk = jnp.sum(rmask * ((p1 - p2) * (lp1 - lp2)))

    # ---------- tau-sharpened softmaxes (reused for EH / HE / nuc-norm) ------
    inv_tau = 1.0 / tau
    sp1, lsp1 = _softmax_and_log(f1 * inv_tau)
    sp2, lsp2 = _softmax_and_log(f2 * inv_tau)
    sp1_ref[...] = sp1
    sp2_ref[...] = sp2

    eh_blk = -(jnp.sum(rmask * sp1 * lsp1) + jnp.sum(rmask * sp2 * lsp2))
    he1 = jnp.sum(rmask * sp1, axis=0, keepdims=True)     # (1, d_pad)
    he2 = jnp.sum(rmask * sp2, axis=0, keepdims=True)

    # ---------- KDE: one (tm, n_pad) gram tile per view ----------
    # bf16 operands on the MXU, f32 accumulation; contraction on the last dims
    # of both operands (no XLU transpose).
    o_blk = o_all_ref[pl.ds(row0, tm), :]
    t_blk = t_all_ref[pl.ds(row0, tm), :]
    dn = (((1,), (1,)), ((), ()))
    ms = jax.lax.dot_general(o_blk, o_all_ref[...], dn,
                             preferred_element_type=jnp.float32)
    ts = jax.lax.dot_general(t_blk, t_all_ref[...], dn,
                             preferred_element_type=jnp.float32)
    cmask = (jax.lax.broadcasted_iota(jnp.int32, (1, n_pad), 1)
             < n_rows).astype(jnp.float32)
    # clamp: cos can round slightly below -1 -> keep (cos+1)/2 >= 0 for the log
    ms = cmask * jnp.maximum((ms + 1.0) * 0.5, 0.0)
    ts = cmask * jnp.maximum((ts + 1.0) * 0.5, 0.0)
    ms = ms * pl.reciprocal(jnp.sum(ms, axis=1, keepdims=True), approx=True)
    ts = ts * pl.reciprocal(jnp.sum(ts, axis=1, keepdims=True), approx=True)
    ratio = (ts + _CEPS) * pl.reciprocal(ms + _CEPS, approx=True)
    kde_blk = jnp.sum(rmask * (ts * jnp.log(ratio)))

    # ---------- per-block partials: one lane-dense (8, d_pad) tile ----------
    # row 0: colsum(sp1), row 1: colsum(sp2), row 2 lanes 0..2: kl/eh/kde.
    sub = jax.lax.broadcasted_iota(jnp.int32, (8, d_pad), 0)
    lane = jax.lax.broadcasted_iota(jnp.int32, (8, d_pad), 1)
    scal = jnp.where(lane == 0, kl_blk,
           jnp.where(lane == 1, eh_blk,
           jnp.where(lane == 2, kde_blk, 0.0)))
    tile = jnp.where(sub == 0, he1,
           jnp.where(sub == 1, he2,
           jnp.where(sub == 2, scal, 0.0)))
    part_ref[0] = tile


def _round_up(x, m):
    return ((x + m - 1) // m) * m


def _l2_normalize_rows(x, eps=_CEPS):
    norm = jnp.sqrt(jnp.sum(x * x, axis=-1, keepdims=True))
    y = x / (norm + eps)
    return jnp.where(jnp.isnan(y), 0.0, y)


def _vmem_limit_bytes(est):
    try:
        cap = int(pltpu.get_tpu_info().vmem_capacity_bytes)
    except Exception:
        cap = 64 * 1024 * 1024            # conservative (v7x per-TC VMEM)
    hi = int(cap * 0.85)                  # headroom for compiler scratch
    return int(min(max(2 * est, 32 * 1024 * 1024), hi))


def ent_loss(feat1, feat2, args, lam1, lam2):
    n, d = feat1.shape
    eps = float(args.EPS)
    tau = float(args.tau)

    # Lane/sublane-dense padding: D -> multiple of 128, N -> multiple of tm.
    d_pad = _round_up(d, 128)
    tm = min(256, _round_up(n, 8))
    n_pad = _round_up(n, tm)
    nblk = n_pad // tm

    f32 = jnp.float32
    feat1 = feat1.astype(f32)
    feat2 = feat2.astype(f32)

    # Column padding = -1e30: padded classes get exactly 0 softmax weight.
    base = jnp.full((n_pad, d_pad), _NEG, dtype=f32)
    f1p = base.at[:n, :d].set(feat1)
    f2p = base.at[:n, :d].set(feat2)

    # Row-L2-normalized copies for the cosine-similarity grams (zero-padded;
    # bf16 halves their VMEM residency and runs the MXU at native bf16 rate).
    z = jnp.zeros((n_pad, d_pad), dtype=f32)
    o_all = _l2_normalize_rows(z.at[:n, :d].set(feat1)).astype(jnp.bfloat16)
    t_all = _l2_normalize_rows(z.at[:n, :d].set(feat2)).astype(jnp.bfloat16)

    kernel = functools.partial(_entloss_kernel, tau=tau, tm=tm,
                               n_rows=n, n_pad=n_pad, d_pad=d_pad)

    est = (2 * 2 * tm * d_pad * 4       # f1/f2 tiles (double buffered)
           + 2 * n_pad * d_pad * 2      # o_all/t_all bf16 (single buffered)
           + 2 * 2 * tm * d_pad * 4     # sp1/sp2 output tiles
           + 2 * tm * n_pad * 4         # ms/ts gram tiles
           + 12 * tm * d_pad * 4)       # softmax temporaries
    vmem_limit = _vmem_limit_bytes(est)

    def build_call(single_buffer_consts):
        pipe = {"pipeline_mode": pl.Buffered(1)} if single_buffer_consts else {}
        return pl.pallas_call(
            kernel,
            out_shape=(jax.ShapeDtypeStruct((nblk, 8, d_pad), f32),
                       jax.ShapeDtypeStruct((n_pad, d_pad), f32),
                       jax.ShapeDtypeStruct((n_pad, d_pad), f32)),
            grid_spec=pltpu.PrefetchScalarGridSpec(
                num_scalar_prefetch=0,
                grid=(nblk,),
                in_specs=[pl.BlockSpec((tm, d_pad), lambda i: (i, 0)),
                          pl.BlockSpec((tm, d_pad), lambda i: (i, 0)),
                          # constant full blocks: single-buffered (index never changes)
                          pl.BlockSpec((n_pad, d_pad), lambda i: (0, 0), **pipe),
                          pl.BlockSpec((n_pad, d_pad), lambda i: (0, 0), **pipe)],
                out_specs=(pl.BlockSpec((1, 8, d_pad), lambda i: (i, 0, 0)),
                           pl.BlockSpec((tm, d_pad), lambda i: (i, 0)),
                           pl.BlockSpec((tm, d_pad), lambda i: (i, 0)))),
            compiler_params=pltpu.CompilerParams(
                # Every grid step is independent (per-block partial outputs),
                # so the row-block axis can shard across TensorCores.
                dimension_semantics=("parallel",),
                vmem_limit_bytes=vmem_limit),
        )

    try:
        part, sp1p, sp2p = build_call(True)(f1p, f2p, o_all, t_all)
    except Exception:
        # Fallback if single-buffered constant blocks are not supported.
        part, sp1p, sp2p = build_call(False)(f1p, f2p, o_all, t_all)

    inv_n = 1.0 / float(n)
    kl = 0.5 * jnp.sum(part[:, 2, 0]) * inv_n
    eh = 0.5 * jnp.sum(part[:, 2, 1]) * inv_n
    kde = jnp.sum(part[:, 2, 2]) * (inv_n * inv_n)

    m1 = jnp.sum(part[:, 0, :d], axis=0) * inv_n
    m2 = jnp.sum(part[:, 1, :d], axis=0) * inv_n
    he = -0.5 * (jnp.sum(m1 * jnp.log(m1 + eps)) +
                 jnp.sum(m2 * jnp.log(m2 + eps)))

    final = kl + ((1.0 + lam1) * eh - lam2 * he)

    sp1 = sp1p[:n, :d]
    sp2 = sp2p[:n, :d]
    # TODO(synk): nuclear norm needs an SVD -- no Pallas equivalent; done in
    # plain JAX reusing the kernel's sharpened-softmax outputs (no recompute).
    nuc = lambda x: jnp.sum(jnp.linalg.svd(x, compute_uv=False))
    n_norm = -0.5 * (nuc(sp1) + nuc(sp2)) * 0.001

    return {'kl': kl, 'eh': eh, 'he': he, 'final': final,
            'kde': kde, 'n-norm': n_norm, 'final-kde': kde * 100.0 + final}


def _reference(feat1, feat2, args, lam1, lam2):
    """Pure-JAX mirror of the PyTorch EntLoss forward (for validation)."""
    EPS, tau = args.EPS, args.tau
    sm = lambda x: jax.nn.softmax(x, axis=-1)
    p1, p2 = sm(feat1), sm(feat2)
    KL = lambda a, b: jnp.mean(jnp.sum(
        a * (jnp.log(a + EPS) - jnp.log(b + EPS)), axis=1))
    kl = 0.5 * (KL(p1, p2) + KL(p2, p1))
    sp1, sp2 = sm(feat1 / tau), sm(feat2 / tau)
    EH = lambda p: jnp.mean(-jnp.sum(p * jnp.log(p + EPS), axis=1))
    eh = 0.5 * (EH(sp1) + EH(sp2))

    def HE(p):
        m = jnp.mean(p, axis=0)
        return -jnp.sum(m * jnp.log(m + EPS))
    he = 0.5 * (HE(sp1) + HE(sp2))
    final = kl + (1.0 + lam1) * eh - lam2 * he

    def cos_loss(o, t, ceps=1e-7):
        on = jnp.sqrt(jnp.sum(o ** 2, axis=1, keepdims=True))
        o = o / (on + ceps); o = jnp.where(jnp.isnan(o), 0.0, o)
        tn = jnp.sqrt(jnp.sum(t ** 2, axis=1, keepdims=True))
        t = t / (tn + ceps); t = jnp.where(jnp.isnan(t), 0.0, t)
        ms = (o @ o.T + 1.0) / 2.0
        ts = (t @ t.T + 1.0) / 2.0
        ms = ms / jnp.sum(ms, axis=1, keepdims=True)
        ts = ts / jnp.sum(ts, axis=1, keepdims=True)
        return jnp.mean(ts * jnp.log((ts + ceps) / (ms + ceps)))
    kde = cos_loss(feat1, feat2)

    nuc = lambda x: jnp.sum(jnp.linalg.svd(x, compute_uv=False))
    n_norm = -0.5 * (nuc(sp1) + nuc(sp2)) * 0.001
    return {'kl': kl, 'eh': eh, 'he': he, 'final': final,
            'kde': kde, 'n-norm': n_norm, 'final-kde': kde * 100.0 + final}


if __name__ == "__main__":
    # EntLoss has no learnable weights, only hyper-parameters fixed here.
    args = SimpleNamespace(EPS=1e-8, tau=0.5)
    lam1, lam2 = 1.0, 1.0

    key = jax.random.PRNGKey(0)
    k1, k2 = jax.random.split(key)
    N, D = 12, 32   # exercises row padding (N->16) and lane padding (D->128)
    feat1 = jax.random.normal(k1, (N, D), dtype=jnp.float32)
    feat2 = jax.random.normal(k2, (N, D), dtype=jnp.float32)

    loss = jax.block_until_ready(ent_loss(feat1, feat2, args, lam1, lam2))
    ref = jax.block_until_ready(_reference(feat1, feat2, args, lam1, lam2))

    # Tolerances: kl/eh/he/final are exact up to O(EPS); kde uses bf16 grams +
    # approx reciprocals (loose tolerance on a small scalar loss).
    tol = {'kl': (1e-3, 1e-4), 'eh': (1e-3, 1e-4), 'he': (1e-3, 1e-4),
           'final': (1e-3, 1e-4), 'n-norm': (1e-3, 1e-5),
           'kde': (0.3, 5e-3), 'final-kde': (0.1, 0.5)}
    for k, (rt, at) in tol.items():
        a, b = float(loss[k]), float(ref[k])
        if not abs(a - b) <= at + rt * abs(b):
            raise AssertionError(f"{k}: kernel={a} ref={b}")

    print("KERNEL_OK")
</pallas_src>

<mosaic_0001>
module attributes {stable_mosaic.version = 11 : i64} {
  func.func @_entloss_kernel(%arg0: i32, %arg1: memref<16x128xf32, #tpu.memory_space<vmem>>, %arg2: memref<16x128xf32, #tpu.memory_space<vmem>>, %arg3: memref<16x128xbf16, #tpu.memory_space<vmem>>, %arg4: memref<16x128xbf16, #tpu.memory_space<vmem>>, %arg5: memref<1x8x128xf32, #tpu.memory_space<vmem>>, %arg6: memref<16x128xf32, #tpu.memory_space<vmem>>, %arg7: memref<16x128xf32, #tpu.memory_space<vmem>>) attributes {dimension_semantics = [#tpu.dimension_semantics<parallel>], iteration_bounds = array<i64: 1>, scalar_prefetch = 0 : i64, scratch_operands = 0 : i64, tpu.core_type = #tpu.core_type<tc>, window_params = [{transform_indices = @transform_0, window_bounds = array<i64: 16, 128>}, {transform_indices = @transform_1, window_bounds = array<i64: 16, 128>}, {pipeline_mode = #tpu.pipeline_mode<synchronous>, transform_indices = @transform_2, window_bounds = array<i64: 16, 128>}, {pipeline_mode = #tpu.pipeline_mode<synchronous>, transform_indices = @transform_3, window_bounds = array<i64: 16, 128>}, {transform_indices = @transform_4, window_bounds = array<i64: 1, 8, 128>}, {transform_indices = @transform_5, window_bounds = array<i64: 16, 128>}, {transform_indices = @transform_6, window_bounds = array<i64: 16, 128>}]} {
    %c16_i32 = arith.constant 16 : i32
    %0 = arith.muli %arg0, %c16_i32 : i32
    %1 = tpu.assume_multiple %0, 16 : i32
    %2 = tpu.iota {dimensions = array<i32: 0>} : vector<16x1xi32>
    %3 = vector.broadcast %1 : i32 to vector<16x1xi32>
    %4 = arith.addi %3, %2 : vector<16x1xi32>
    %c12_i32 = arith.constant 12 : i32
    %5 = vector.broadcast %c12_i32 : i32 to vector<16x1xi32>
    %6 = arith.cmpi slt, %4, %5 : vector<16x1xi32>
    %7 = arith.extui %6 : vector<16x1xi1> to vector<16x1xi32>
    %8 = arith.sitofp %7 : vector<16x1xi32> to vector<16x1xf32>
    %c0 = arith.constant 0 : index
    %c0_0 = arith.constant 0 : index
    %9 = vector.load %arg1[%c0, %c0_0] : memref<16x128xf32, #tpu.memory_space<vmem>>, vector<16x128xf32>
    %c0_1 = arith.constant 0 : index
    %c0_2 = arith.constant 0 : index
    %10 = vector.load %arg2[%c0_1, %c0_2] : memref<16x128xf32, #tpu.memory_space<vmem>>, vector<16x128xf32>
    %cst = arith.constant dense<0xFF800000> : vector<16xf32>
    %11 = vector.multi_reduction <maximumf>, %9, %cst [1] : vector<16x128xf32> to vector<16xf32>
    %12 = vector.shape_cast %11 : vector<16xf32> to vector<16x1xf32>
    %13 = vector.broadcast %12 : vector<16x1xf32> to vector<16x128xf32>
    %14 = arith.subf %9, %13 : vector<16x128xf32>
    %15 = math.exp %14 : vector<16x128xf32>
    %cst_3 = arith.constant dense<0.000000e+00> : vector<16xf32>
    %16 = vector.multi_reduction <add>, %15, %cst_3 [1] : vector<16x128xf32> to vector<16xf32>
    %17 = vector.shape_cast %16 : vector<16xf32> to vector<16x1xf32>
    %18 = vector.broadcast %17 : vector<16x1xf32> to vector<16x128xf32>
    %19 = arith.divf %15, %18 : vector<16x128xf32>
    %20 = math.log %17 : vector<16x1xf32>
    %21 = vector.broadcast %20 : vector<16x1xf32> to vector<16x128xf32>
    %22 = arith.subf %14, %21 : vector<16x128xf32>
    %cst_4 = arith.constant dense<0xFF800000> : vector<16xf32>
    %23 = vector.multi_reduction <maximumf>, %10, %cst_4 [1] : vector<16x128xf32> to vector<16xf32>
    %24 = vector.shape_cast %23 : vector<16xf32> to vector<16x1xf32>
    %25 = vector.broadcast %24 : vector<16x1xf32> to vector<16x128xf32>
    %26 = arith.subf %10, %25 : vector<16x128xf32>
    %27 = math.exp %26 : vector<16x128xf32>
    %cst_5 = arith.constant dense<0.000000e+00> : vector<16xf32>
    %28 = vector.multi_reduction <add>, %27, %cst_5 [1] : vector<16x128xf32> to vector<16xf32>
    %29 = vector.shape_cast %28 : vector<16xf32> to vector<16x1xf32>
    %30 = vector.broadcast %29 : vector<16x1xf32> to vector<16x128xf32>
    %31 = arith.divf %27, %30 : vector<16x128xf32>
    %32 = math.log %29 : vector<16x1xf32>
    %33 = vector.broadcast %32 : vector<16x1xf32> to vector<16x128xf32>
    %34 = arith.subf %26, %33 : vector<16x128xf32>
    %35 = arith.subf %19, %31 : vector<16x128xf32>
    %36 = arith.subf %22, %34 : vector<16x128xf32>
    %37 = arith.mulf %35, %36 : vector<16x128xf32>
    %38 = vector.broadcast %8 : vector<16x1xf32> to vector<16x128xf32>
    %39 = arith.mulf %38, %37 : vector<16x128xf32>
    %40 = vector.shape_cast %39 : vector<16x128xf32> to vector<1x16x128xf32>
    %cst_6 = arith.constant dense<0.000000e+00> : vector<1xf32>
    %41 = vector.multi_reduction <add>, %40, %cst_6 [1, 2] : vector<1x16x128xf32> to vector<1xf32>
    %42 = vector.shape_cast %41 : vector<1xf32> to vector<1x1x1xf32>
    %43 = vector.extract %42[0, 0, 0] : f32 from vector<1x1x1xf32>
    %cst_7 = arith.constant 2.000000e+00 : f32
    %44 = vector.broadcast %cst_7 : f32 to vector<16x128xf32>
    %45 = arith.mulf %9, %44 : vector<16x128xf32>
    %cst_8 = arith.constant dense<0xFF800000> : vector<16xf32>
    %46 = vector.multi_reduction <maximumf>, %45, %cst_8 [1] : vector<16x128xf32> to vector<16xf32>
    %47 = vector.shape_cast %46 : vector<16xf32> to vector<16x1xf32>
    %48 = vector.broadcast %47 : vector<16x1xf32> to vector<16x128xf32>
    %49 = arith.subf %45, %48 : vector<16x128xf32>
    %50 = math.exp %49 : vector<16x128xf32>
    %cst_9 = arith.constant dense<0.000000e+00> : vector<16xf32>
    %51 = vector.multi_reduction <add>, %50, %cst_9 [1] : vector<16x128xf32> to vector<16xf32>
    %52 = vector.shape_cast %51 : vector<16xf32> to vector<16x1xf32>
    %53 = vector.broadcast %52 : vector<16x1xf32> to vector<16x128xf32>
    %54 = arith.divf %50, %53 : vector<16x128xf32>
    %55 = math.log %52 : vector<16x1xf32>
    %56 = vector.broadcast %55 : vector<16x1xf32> to vector<16x128xf32>
    %57 = arith.subf %49, %56 : vector<16x128xf32>
    %cst_10 = arith.constant 2.000000e+00 : f32
    %58 = vector.broadcast %cst_10 : f32 to vector<16x128xf32>
    %59 = arith.mulf %10, %58 : vector<16x128xf32>
    %cst_11 = arith.constant dense<0xFF800000> : vector<16xf32>
    %60 = vector.multi_reduction <maximumf>, %59, %cst_11 [1] : vector<16x128xf32> to vector<16xf32>
    %61 = vector.shape_cast %60 : vector<16xf32> to vector<16x1xf32>
    %62 = vector.broadcast %61 : vector<16x1xf32> to vector<16x128xf32>
    %63 = arith.subf %59, %62 : vector<16x128xf32>
    %64 = math.exp %63 : vector<16x128xf32>
    %cst_12 = arith.constant dense<0.000000e+00> : vector<16xf32>
    %65 = vector.multi_reduction <add>, %64, %cst_12 [1] : vector<16x128xf32> to vector<16xf32>
    %66 = vector.shape_cast %65 : vector<16xf32> to vector<16x1xf32>
    %67 = vector.broadcast %66 : vector<16x1xf32> to vector<16x128xf32>
    %68 = arith.divf %64, %67 : vector<16x128xf32>
    %69 = math.log %66 : vector<16x1xf32>
    %70 = vector.broadcast %69 : vector<16x1xf32> to vector<16x128xf32>
    %71 = arith.subf %63, %70 : vector<16x128xf32>
    %c0_13 = arith.constant 0 : index
    %c0_14 = arith.constant 0 : index
    %72 = vector.load %arg6[%c0_13, %c0_14] : memref<16x128xf32, #tpu.memory_space<vmem>>, vector<16x128xf32>
    tpu.vector_store %arg6[%c0_13, %c0_14], %54 {strides = array<i32>} : memref<16x128xf32, #tpu.memory_space<vmem>>, vector<16x128xf32>,
    %c0_15 = arith.constant 0 : index
    %c0_16 = arith.constant 0 : index
    %73 = vector.load %arg7[%c0_15, %c0_16] : memref<16x128xf32, #tpu.memory_space<vmem>>, vector<16x128xf32>
    tpu.vector_store %arg7[%c0_15, %c0_16], %68 {strides = array<i32>} : memref<16x128xf32, #tpu.memory_space<vmem>>, vector<16x128xf32>,
    %74 = vector.broadcast %8 : vector<16x1xf32> to vector<16x128xf32>
    %75 = arith.mulf %74, %54 : vector<16x128xf32>
    %76 = arith.mulf %75, %57 : vector<16x128xf32>
    %77 = vector.shape_cast %76 : vector<16x128xf32> to vector<1x16x128xf32>
    %cst_17 = arith.constant dense<0.000000e+00> : vector<1xf32>
    %78 = vector.multi_reduction <add>, %77, %cst_17 [1, 2] : vector<1x16x128xf32> to vector<1xf32>
    %79 = vector.shape_cast %78 : vector<1xf32> to vector<1x1x1xf32>
    %80 = vector.extract %79[0, 0, 0] : f32 from vector<1x1x1xf32>
    %81 = vector.broadcast %8 : vector<16x1xf32> to vector<16x128xf32>
    %82 = arith.mulf %81, %68 : vector<16x128xf32>
    %83 = arith.mulf %82, %71 : vector<16x128xf32>
    %84 = vector.shape_cast %83 : vector<16x128xf32> to vector<1x16x128xf32>
    %cst_18 = arith.constant dense<0.000000e+00> : vector<1xf32>
    %85 = vector.multi_reduction <add>, %84, %cst_18 [1, 2] : vector<1x16x128xf32> to vector<1xf32>
    %86 = vector.shape_cast %85 : vector<1xf32> to vector<1x1x1xf32>
    %87 = vector.extract %86[0, 0, 0] : f32 from vector<1x1x1xf32>
    %88 = arith.addf %80, %87 : f32
    %cst_19 = arith.constant 0.000000e+00 : f32
    %89 = arith.subf %cst_19, %88 : f32
    %90 = vector.broadcast %8 : vector<16x1xf32> to vector<16x128xf32>
    %91 = arith.mulf %90, %54 : vector<16x128xf32>
    %cst_20 = arith.constant dense<0.000000e+00> : vector<128xf32>
    %92 = vector.multi_reduction <add>, %91, %cst_20 [0] : vector<16x128xf32> to vector<128xf32>
    %93 = vector.shape_cast %92 : vector<128xf32> to vector<1x128xf32>
    %94 = vector.broadcast %8 : vector<16x1xf32> to vector<16x128xf32>
    %95 = arith.mulf %94, %68 : vector<16x128xf32>
    %cst_21 = arith.constant dense<0.000000e+00> : vector<128xf32>
    %96 = vector.multi_reduction <add>, %95, %cst_21 [0] : vector<16x128xf32> to vector<128xf32>
    %97 = vector.shape_cast %96 : vector<128xf32> to vector<1x128xf32>
    %98 = arith.index_cast %1 : i32 to index
    %c0_22 = arith.constant 0 : index
    %99 = vector.load %arg3[%98, %c0_22] : memref<16x128xbf16, #tpu.memory_space<vmem>>, vector<16x128xbf16>
    %100 = arith.index_cast %1 : i32 to index
    %c0_23 = arith.constant 0 : index
    %101 = vector.load %arg4[%100, %c0_23] : memref<16x128xbf16, #tpu.memory_space<vmem>>, vector<16x128xbf16>
    %c0_24 = arith.constant 0 : index
    %c0_25 = arith.constant 0 : index
    %102 = vector.load %arg3[%c0_24, %c0_25] : memref<16x128xbf16, #tpu.memory_space<vmem>>, vector<16x128xbf16>
    %cst_26 = arith.constant dense<0.000000e+00> : vector<16x16xf32>
    %103 = tpu.matmul %99, %102, %cst_26 {dimension_numbers = #tpu.dot_dimension_numbers<[1], [1], [0], [0], [0, 0, 1, 0], [], []>} : vector<16x128xbf16>, vector<16x128xbf16>, vector<16x16xf32> -> vector<16x16xf32>
    %c0_27 = arith.constant 0 : index
    %c0_28 = arith.constant 0 : index
    %104 = vector.load %arg4[%c0_27, %c0_28] : memref<16x128xbf16, #tpu.memory_space<vmem>>, vector<16x128xbf16>
    %cst_29 = arith.constant dense<0.000000e+00> : vector<16x16xf32>
    %105 = tpu.matmul %101, %104, %cst_29 {dimension_numbers = #tpu.dot_dimension_numbers<[1], [1], [0], [0], [0, 0, 1, 0], [], []>} : vector<16x128xbf16>, vector<16x128xbf16>, vector<16x16xf32> -> vector<16x16xf32>
    %106 = tpu.iota {dimensions = array<i32: 1>} : vector<1x16xi32>
    %c12_i32_30 = arith.constant 12 : i32
    %107 = vector.broadcast %c12_i32_30 : i32 to vector<1x16xi32>
    %108 = arith.cmpi slt, %106, %107 : vector<1x16xi32>
    %109 = arith.extui %108 : vector<1x16xi1> to vector<1x16xi32>
    %110 = arith.sitofp %109 : vector<1x16xi32> to vector<1x16xf32>
    %cst_31 = arith.constant 1.000000e+00 : f32
    %111 = vector.broadcast %cst_31 : f32 to vector<16x16xf32>
    %112 = arith.addf %103, %111 : vector<16x16xf32>
    %cst_32 = arith.constant 5.000000e-01 : f32
    %113 = vector.broadcast %cst_32 : f32 to vector<16x16xf32>
    %114 = arith.mulf %112, %113 : vector<16x16xf32>
    %cst_33 = arith.constant 0.000000e+00 : f32
    %115 = vector.broadcast %cst_33 : f32 to vector<16x16xf32>
    %116 = arith.maximumf %114, %115 : vector<16x16xf32>
    %117 = vector.broadcast %110 : vector<1x16xf32> to vector<16x16xf32>
    %118 = arith.mulf %117, %116 : vector<16x16xf32>
    %cst_34 = arith.constant 1.000000e+00 : f32
    %119 = vector.broadcast %cst_34 : f32 to vector<16x16xf32>
    %120 = arith.addf %105, %119 : vector<16x16xf32>
    %cst_35 = arith.constant 5.000000e-01 : f32
    %121 = vector.broadcast %cst_35 : f32 to vector<16x16xf32>
    %122 = arith.mulf %120, %121 : vector<16x16xf32>
    %cst_36 = arith.constant 0.000000e+00 : f32
    %123 = vector.broadcast %cst_36 : f32 to vector<16x16xf32>
    %124 = arith.maximumf %122, %123 : vector<16x16xf32>
    %125 = vector.broadcast %110 : vector<1x16xf32> to vector<16x16xf32>
    %126 = arith.mulf %125, %124 : vector<16x16xf32>
    %cst_37 = arith.constant dense<0.000000e+00> : vector<16xf32>
    %127 = vector.multi_reduction <add>, %118, %cst_37 [1] : vector<16x16xf32> to vector<16xf32>
    %128 = vector.shape_cast %127 : vector<16xf32> to vector<16x1xf32>
    %129 = tpu.reciprocal %128 {approx = true} : vector<16x1xf32> -> vector<16x1xf32>
    %130 = vector.broadcast %129 : vector<16x1xf32> to vector<16x16xf32>
    %131 = arith.mulf %118, %130 : vector<16x16xf32>
    %cst_38 = arith.constant dense<0.000000e+00> : vector<16xf32>
    %132 = vector.multi_reduction <add>, %126, %cst_38 [1] : vector<16x16xf32> to vector<16xf32>
    %133 = vector.shape_cast %132 : vector<16xf32> to vector<16x1xf32>
    %134 = tpu.reciprocal %133 {approx = true} : vector<16x1xf32> -> vector<16x1xf32>
    %135 = vector.broadcast %134 : vector<16x1xf32> to vector<16x16xf32>
    %136 = arith.mulf %126, %135 : vector<16x16xf32>
    %cst_39 = arith.constant 1.000000e-07 : f32
    %137 = vector.broadcast %cst_39 : f32 to vector<16x16xf32>
    %138 = arith.addf %136, %137 : vector<16x16xf32>
    %cst_40 = arith.constant 1.000000e-07 : f32
    %139 = vector.broadcast %cst_40 : f32 to vector<16x16xf32>
    %140 = arith.addf %131, %139 : vector<16x16xf32>
    %141 = tpu.reciprocal %140 {approx = true} : vector<16x16xf32> -> vector<16x16xf32>
    %142 = arith.mulf %138, %141 : vector<16x16xf32>
    %143 = math.log %142 : vector<16x16xf32>
    %144 = arith.mulf %136, %143 : vector<16x16xf32>
    %145 = vector.broadcast %8 : vector<16x1xf32> to vector<16x16xf32>
    %146 = arith.mulf %145, %144 : vector<16x16xf32>
    %147 = vector.shape_cast %146 : vector<16x16xf32> to vector<1x16x16xf32>
    %cst_41 = arith.constant dense<0.000000e+00> : vector<1xf32>
    %148 = vector.multi_reduction <add>, %147, %cst_41 [1, 2] : vector<1x16x16xf32> to vector<1xf32>
    %149 = vector.shape_cast %148 : vector<1xf32> to vector<1x1x1xf32>
    %150 = vector.extract %149[0, 0, 0] : f32 from vector<1x1x1xf32>
    %151 = tpu.iota {dimensions = array<i32: 0>} : vector<8x128xi32>
    %152 = tpu.iota {dimensions = array<i32: 1>} : vector<8x128xi32>
    %c0_i32 = arith.constant 0 : i32
    %153 = vector.broadcast %c0_i32 : i32 to vector<8x128xi32>
    %154 = arith.cmpi eq, %152, %153 : vector<8x128xi32>
    %c1_i32 = arith.constant 1 : i32
    %155 = vector.broadcast %c1_i32 : i32 to vector<8x128xi32>
    %156 = arith.cmpi eq, %152, %155 : vector<8x128xi32>
    %c2_i32 = arith.constant 2 : i32
    %157 = vector.broadcast %c2_i32 : i32 to vector<8x128xi32>
    %158 = arith.cmpi eq, %152, %157 : vector<8x128xi32>
    %cst_42 = arith.constant 0.000000e+00 : f32
    %159 = vector.broadcast %150 : f32 to vector<8x128xf32>
    %160 = vector.broadcast %cst_42 : f32 to vector<8x128xf32>
    %161 = arith.select %158, %159, %160 : vector<8x128xi1>, vector<8x128xf32>
    %162 = vector.broadcast %89 : f32 to vector<8x128xf32>
    %163 = arith.select %156, %162, %161 : vector<8x128xi1>, vector<8x128xf32>
    %164 = vector.broadcast %43 : f32 to vector<8x128xf32>
    %165 = arith.select %154, %164, %163 : vector<8x128xi1>, vector<8x128xf32>
    %c0_i32_43 = arith.constant 0 : i32
    %166 = vector.broadcast %c0_i32_43 : i32 to vector<8x128xi32>
    %167 = arith.cmpi eq, %151, %166 : vector<8x128xi32>
    %c1_i32_44 = arith.constant 1 : i32
    %168 = vector.broadcast %c1_i32_44 : i32 to vector<8x128xi32>
    %169 = arith.cmpi eq, %151, %168 : vector<8x128xi32>
    %c2_i32_45 = arith.constant 2 : i32
    %170 = vector.broadcast %c2_i32_45 : i32 to vector<8x128xi32>
    %171 = arith.cmpi eq, %151, %170 : vector<8x128xi32>
    %cst_46 = arith.constant 0.000000e+00 : f32
    %172 = vector.broadcast %cst_46 : f32 to vector<8x128xf32>
    %173 = arith.select %171, %165, %172 : vector<8x128xi1>, vector<8x128xf32>
    %174 = vector.shape_cast %97 : vector<1x128xf32> to vector<1x128xf32>
    %175 = vector.broadcast %174 : vector<1x128xf32> to vector<8x128xf32>
    %176 = arith.select %169, %175, %173 : vector<8x128xi1>, vector<8x128xf32>
    %177 = vector.shape_cast %93 : vector<1x128xf32> to vector<1x128xf32>
    %178 = vector.broadcast %177 : vector<1x128xf32> to vector<8x128xf32>
    %179 = arith.select %167, %178, %176 : vector<8x128xi1>, vector<8x128xf32>
    %c0_47 = arith.constant 0 : index
    %c0_48 = arith.constant 0 : index
    %c0_49 = arith.constant 0 : index
    %180 = vector.load %arg5[%c0_47, %c0_48, %c0_49] : memref<1x8x128xf32, #tpu.memory_space<vmem>>, vector<1x8x128xf32>
    %181 = vector.shape_cast %180 : vector<1x8x128xf32> to vector<8x128xf32>
    %182 = vector.shape_cast %179 : vector<8x128xf32> to vector<1x8x128xf32>
    tpu.vector_store %arg5[%c0_47, %c0_48, %c0_49], %182 {strides = array<i32>} : memref<1x8x128xf32, #tpu.memory_space<vmem>>, vector<1x8x128xf32>,
    return
  }
  func.func @transform_0(%arg0: i32) -> (i32, i32) {
    %c0_i32 = arith.constant 0 : i32
    %c0_i32_0 = arith.constant 0 : i32
    return %arg0, %c0_i32 : i32, i32
  }
  func.func @transform_1(%arg0: i32) -> (i32, i32) {
    %c0_i32 = arith.constant 0 : i32
    %c0_i32_0 = arith.constant 0 : i32
    return %arg0, %c0_i32 : i32, i32
  }
  func.func @transform_2(%arg0: i32) -> (i32, i32) {
    %c0_i32 = arith.constant 0 : i32
    %c0_i32_0 = arith.constant 0 : i32
    %c0_i32_1 = arith.constant 0 : i32
    return %c0_i32, %c0_i32_0 : i32, i32
  }
  func.func @transform_3(%arg0: i32) -> (i32, i32) {
    %c0_i32 = arith.constant 0 : i32
    %c0_i32_0 = arith.constant 0 : i32
    %c0_i32_1 = arith.constant 0 : i32
    return %c0_i32, %c0_i32_0 : i32, i32
  }
  func.func @transform_4(%arg0: i32) -> (i32, i32, i32) {
    %c0_i32 = arith.constant 0 : i32
    %c0_i32_0 = arith.constant 0 : i32
    %c0_i32_1 = arith.constant 0 : i32
    return %arg0, %c0_i32, %c0_i32_0 : i32, i32, i32
  }
  func.func @transform_5(%arg0: i32) -> (i32, i32) {
    %c0_i32 = arith.constant 0 : i32
    %c0_i32_0 = arith.constant 0 : i32
    return %arg0, %c0_i32 : i32, i32
  }
  func.func @transform_6(%arg0: i32) -> (i32, i32) {
    %c0_i32 = arith.constant 0 : i32
    %c0_i32_0 = arith.constant 0 : i32
    return %arg0, %c0_i32 : i32, i32
  }
}

module attributes {stable_mosaic.version = 11 : i64} {
  func.func @_entloss_kernel(%arg0: i32, %arg1: memref<16x128xf32, #tpu.memory_space<vmem>>, %arg2: memref<16x128xf32, #tpu.memory_space<vmem>>, %arg3: memref<16x128xbf16, #tpu.memory_space<vmem>>, %arg4: memref<16x128xbf16, #tpu.memory_space<vmem>>, %arg5: memref<1x8x128xf32, #tpu.memory_space<vmem>>, %arg6: memref<16x128xf32, #tpu.memory_space<vmem>>, %arg7: memref<16x128xf32, #tpu.memory_space<vmem>>) attributes {dimension_semantics = [#tpu.dimension_semantics<parallel>], iteration_bounds = array<i64: 1>, scalar_prefetch = 0 : i64, scratch_operands = 0 : i64, tpu.core_type = #tpu.core_type<tc>, window_params = [{transform_indices = @transform_0, window_bounds = array<i64: 16, 128>}, {transform_indices = @transform_1, window_bounds = array<i64: 16, 128>}, {pipeline_mode = #tpu.pipeline_mode<synchronous>, transform_indices = @transform_2, window_bounds = array<i64: 16, 128>}, {pipeline_mode = #tpu.pipeline_mode<synchronous>, transform_indices = @transform_3, window_bounds = array<i64: 16, 128>}, {transform_indices = @transform_4, window_bounds = array<i64: 1, 8, 128>}, {transform_indices = @transform_5, window_bounds = array<i64: 16, 128>}, {transform_indices = @transform_6, window_bounds = array<i64: 16, 128>}]} {
    %c16_i32 = arith.constant 16 : i32
    %0 = arith.muli %arg0, %c16_i32 : i32
    %1 = tpu.assume_multiple %0, 16 : i32
    %2 = tpu.iota {dimensions = array<i32: 0>} : vector<16x1xi32>
    %3 = vector.broadcast %1 : i32 to vector<16x1xi32>
    %4 = arith.addi %3, %2 : vector<16x1xi32>
    %c12_i32 = arith.constant 12 : i32
    %5 = vector.broadcast %c12_i32 : i32 to vector<16x1xi32>
    %6 = arith.cmpi slt, %4, %5 : vector<16x1xi32>
    %7 = arith.extui %6 : vector<16x1xi1> to vector<16x1xi32>
    %8 = arith.sitofp %7 : vector<16x1xi32> to vector<16x1xf32>
    %c0 = arith.constant 0 : index
    %c0_0 = arith.constant 0 : index
    %9 = vector.load %arg1[%c0, %c0_0] : memref<16x128xf32, #tpu.memory_space<vmem>>, vector<16x128xf32>
    %c0_1 = arith.constant 0 : index
    %c0_2 = arith.constant 0 : index
    %10 = vector.load %arg2[%c0_1, %c0_2] : memref<16x128xf32, #tpu.memory_space<vmem>>, vector<16x128xf32>
    %cst = arith.constant dense<0xFF800000> : vector<16xf32>
    %11 = vector.multi_reduction <maximumf>, %9, %cst [1] : vector<16x128xf32> to vector<16xf32>
    %12 = vector.shape_cast %11 : vector<16xf32> to vector<16x1xf32>
    %13 = vector.broadcast %12 : vector<16x1xf32> to vector<16x128xf32>
    %14 = arith.subf %9, %13 : vector<16x128xf32>
    %15 = math.exp %14 : vector<16x128xf32>
    %cst_3 = arith.constant dense<0.000000e+00> : vector<16xf32>
    %16 = vector.multi_reduction <add>, %15, %cst_3 [1] : vector<16x128xf32> to vector<16xf32>
    %17 = vector.shape_cast %16 : vector<16xf32> to vector<16x1xf32>
    %18 = vector.broadcast %17 : vector<16x1xf32> to vector<16x128xf32>
    %19 = arith.divf %15, %18 : vector<16x128xf32>
    %20 = math.log %17 : vector<16x1xf32>
    %21 = vector.broadcast %20 : vector<16x1xf32> to vector<16x128xf32>
    %22 = arith.subf %14, %21 : vector<16x128xf32>
    %cst_4 = arith.constant dense<0xFF800000> : vector<16xf32>
    %23 = vector.multi_reduction <maximumf>, %10, %cst_4 [1] : vector<16x128xf32> to vector<16xf32>
    %24 = vector.shape_cast %23 : vector<16xf32> to vector<16x1xf32>
    %25 = vector.broadcast %24 : vector<16x1xf32> to vector<16x128xf32>
    %26 = arith.subf %10, %25 : vector<16x128xf32>
    %27 = math.exp %26 : vector<16x128xf32>
    %cst_5 = arith.constant dense<0.000000e+00> : vector<16xf32>
    %28 = vector.multi_reduction <add>, %27, %cst_5 [1] : vector<16x128xf32> to vector<16xf32>
    %29 = vector.shape_cast %28 : vector<16xf32> to vector<16x1xf32>
    %30 = vector.broadcast %29 : vector<16x1xf32> to vector<16x128xf32>
    %31 = arith.divf %27, %30 : vector<16x128xf32>
    %32 = math.log %29 : vector<16x1xf32>
    %33 = vector.broadcast %32 : vector<16x1xf32> to vector<16x128xf32>
    %34 = arith.subf %26, %33 : vector<16x128xf32>
    %35 = arith.subf %19, %31 : vector<16x128xf32>
    %36 = arith.subf %22, %34 : vector<16x128xf32>
    %37 = arith.mulf %35, %36 : vector<16x128xf32>
    %38 = vector.broadcast %8 : vector<16x1xf32> to vector<16x128xf32>
    %39 = arith.mulf %38, %37 : vector<16x128xf32>
    %40 = vector.shape_cast %39 : vector<16x128xf32> to vector<1x16x128xf32>
    %cst_6 = arith.constant dense<0.000000e+00> : vector<1xf32>
    %41 = vector.multi_reduction <add>, %40, %cst_6 [1, 2] : vector<1x16x128xf32> to vector<1xf32>
    %42 = vector.shape_cast %41 : vector<1xf32> to vector<1x1x1xf32>
    %43 = vector.extract %42[0, 0, 0] : f32 from vector<1x1x1xf32>
    %cst_7 = arith.constant 2.000000e+00 : f32
    %44 = vector.broadcast %cst_7 : f32 to vector<16x128xf32>
    %45 = arith.mulf %9, %44 : vector<16x128xf32>
    %cst_8 = arith.constant dense<0xFF800000> : vector<16xf32>
    %46 = vector.multi_reduction <maximumf>, %45, %cst_8 [1] : vector<16x128xf32> to vector<16xf32>
    %47 = vector.shape_cast %46 : vector<16xf32> to vector<16x1xf32>
    %48 = vector.broadcast %47 : vector<16x1xf32> to vector<16x128xf32>
    %49 = arith.subf %45, %48 : vector<16x128xf32>
    %50 = math.exp %49 : vector<16x128xf32>
    %cst_9 = arith.constant dense<0.000000e+00> : vector<16xf32>
    %51 = vector.multi_reduction <add>, %50, %cst_9 [1] : vector<16x128xf32> to vector<16xf32>
    %52 = vector.shape_cast %51 : vector<16xf32> to vector<16x1xf32>
    %53 = vector.broadcast %52 : vector<16x1xf32> to vector<16x128xf32>
    %54 = arith.divf %50, %53 : vector<16x128xf32>
    %55 = math.log %52 : vector<16x1xf32>
    %56 = vector.broadcast %55 : vector<16x1xf32> to vector<16x128xf32>
    %57 = arith.subf %49, %56 : vector<16x128xf32>
    %cst_10 = arith.constant 2.000000e+00 : f32
    %58 = vector.broadcast %cst_10 : f32 to vector<16x128xf32>
    %59 = arith.mulf %10, %58 : vector<16x128xf32>
    %cst_11 = arith.constant dense<0xFF800000> : vector<16xf32>
    %60 = vector.multi_reduction <maximumf>, %59, %cst_11 [1] : vector<16x128xf32> to vector<16xf32>
    %61 = vector.shape_cast %60 : vector<16xf32> to vector<16x1xf32>
    %62 = vector.broadcast %61 : vector<16x1xf32> to vector<16x128xf32>
    %63 = arith.subf %59, %62 : vector<16x128xf32>
    %64 = math.exp %63 : vector<16x128xf32>
    %cst_12 = arith.constant dense<0.000000e+00> : vector<16xf32>
    %65 = vector.multi_reduction <add>, %64, %cst_12 [1] : vector<16x128xf32> to vector<16xf32>
    %66 = vector.shape_cast %65 : vector<16xf32> to vector<16x1xf32>
    %67 = vector.broadcast %66 : vector<16x1xf32> to vector<16x128xf32>
    %68 = arith.divf %64, %67 : vector<16x128xf32>
    %69 = math.log %66 : vector<16x1xf32>
    %70 = vector.broadcast %69 : vector<16x1xf32> to vector<16x128xf32>
    %71 = arith.subf %63, %70 : vector<16x128xf32>
    %c0_13 = arith.constant 0 : index
    %c0_14 = arith.constant 0 : index
    %72 = vector.load %arg6[%c0_13, %c0_14] : memref<16x128xf32, #tpu.memory_space<vmem>>, vector<16x128xf32>
    tpu.vector_store %arg6[%c0_13, %c0_14], %54 {strides = array<i32>} : memref<16x128xf32, #tpu.memory_space<vmem>>, vector<16x128xf32>,
    %c0_15 = arith.constant 0 : index
    %c0_16 = arith.constant 0 : index
    %73 = vector.load %arg7[%c0_15, %c0_16] : memref<16x128xf32, #tpu.memory_space<vmem>>, vector<16x128xf32>
    tpu.vector_store %arg7[%c0_15, %c0_16], %68 {strides = array<i32>} : memref<16x128xf32, #tpu.memory_space<vmem>>, vector<16x128xf32>,
    %74 = vector.broadcast %8 : vector<16x1xf32> to vector<16x128xf32>
    %75 = arith.mulf %74, %54 : vector<16x128xf32>
    %76 = arith.mulf %75, %57 : vector<16x128xf32>
    %77 = vector.shape_cast %76 : vector<16x128xf32> to vector<1x16x128xf32>
    %cst_17 = arith.constant dense<0.000000e+00> : vector<1xf32>
    %78 = vector.multi_reduction <add>, %77, %cst_17 [1, 2] : vector<1x16x128xf32> to vector<1xf32>
    %79 = vector.shape_cast %78 : vector<1xf32> to vector<1x1x1xf32>
    %80 = vector.extract %79[0, 0, 0] : f32 from vector<1x1x1xf32>
    %81 = vector.broadcast %8 : vector<16x1xf32> to vector<16x128xf32>
    %82 = arith.mulf %81, %68 : vector<16x128xf32>
    %83 = arith.mulf %82, %71 : vector<16x128xf32>
    %84 = vector.shape_cast %83 : vector<16x128xf32> to vector<1x16x128xf32>
    %cst_18 = arith.constant dense<0.000000e+00> : vector<1xf32>
    %85 = vector.multi_reduction <add>, %84, %cst_18 [1, 2] : vector<1x16x128xf32> to vector<1xf32>
    %86 = vector.shape_cast %85 : vector<1xf32> to vector<1x1x1xf32>
    %87 = vector.extract %86[0, 0, 0] : f32 from vector<1x1x1xf32>
    %88 = arith.addf %80, %87 : f32
    %cst_19 = arith.constant 0.000000e+00 : f32
    %89 = arith.subf %cst_19, %88 : f32
    %90 = vector.broadcast %8 : vector<16x1xf32> to vector<16x128xf32>
    %91 = arith.mulf %90, %54 : vector<16x128xf32>
    %cst_20 = arith.constant dense<0.000000e+00> : vector<128xf32>
    %92 = vector.multi_reduction <add>, %91, %cst_20 [0] : vector<16x128xf32> to vector<128xf32>
    %93 = vector.shape_cast %92 : vector<128xf32> to vector<1x128xf32>
    %94 = vector.broadcast %8 : vector<16x1xf32> to vector<16x128xf32>
    %95 = arith.mulf %94, %68 : vector<16x128xf32>
    %cst_21 = arith.constant dense<0.000000e+00> : vector<128xf32>
    %96 = vector.multi_reduction <add>, %95, %cst_21 [0] : vector<16x128xf32> to vector<128xf32>
    %97 = vector.shape_cast %96 : vector<128xf32> to vector<1x128xf32>
    %98 = arith.index_cast %1 : i32 to index
    %c0_22 = arith.constant 0 : index
    %99 = vector.load %arg3[%98, %c0_22] : memref<16x128xbf16, #tpu.memory_space<vmem>>, vector<16x128xbf16>
    %100 = arith.index_cast %1 : i32 to index
    %c0_23 = arith.constant 0 : index
    %101 = vector.load %arg4[%100, %c0_23] : memref<16x128xbf16, #tpu.memory_space<vmem>>, vector<16x128xbf16>
    %c0_24 = arith.constant 0 : index
    %c0_25 = arith.constant 0 : index
    %102 = vector.load %arg3[%c0_24, %c0_25] : memref<16x128xbf16, #tpu.memory_space<vmem>>, vector<16x128xbf16>
    %cst_26 = arith.constant dense<0.000000e+00> : vector<16x16xf32>
    %103 = tpu.matmul %99, %102, %cst_26 {dimension_numbers = #tpu.dot_dimension_numbers<[1], [1], [0], [0], [0, 0, 1, 0], [], []>} : vector<16x128xbf16>, vector<16x128xbf16>, vector<16x16xf32> -> vector<16x16xf32>
    %c0_27 = arith.constant 0 : index
    %c0_28 = arith.constant 0 : index
    %104 = vector.load %arg4[%c0_27, %c0_28] : memref<16x128xbf16, #tpu.memory_space<vmem>>, vector<16x128xbf16>
    %cst_29 = arith.constant dense<0.000000e+00> : vector<16x16xf32>
    %105 = tpu.matmul %101, %104, %cst_29 {dimension_numbers = #tpu.dot_dimension_numbers<[1], [1], [0], [0], [0, 0, 1, 0], [], []>} : vector<16x128xbf16>, vector<16x128xbf16>, vector<16x16xf32> -> vector<16x16xf32>
    %106 = tpu.iota {dimensions = array<i32: 1>} : vector<1x16xi32>
    %c12_i32_30 = arith.constant 12 : i32
    %107 = vector.broadcast %c12_i32_30 : i32 to vector<1x16xi32>
    %108 = arith.cmpi slt, %106, %107 : vector<1x16xi32>
    %109 = arith.extui %108 : vector<1x16xi1> to vector<1x16xi32>
    %110 = arith.sitofp %109 : vector<1x16xi32> to vector<1x16xf32>
    %cst_31 = arith.constant 1.000000e+00 : f32
    %111 = vector.broadcast %cst_31 : f32 to vector<16x16xf32>
    %112 = arith.addf %103, %111 : vector<16x16xf32>
    %cst_32 = arith.constant 5.000000e-01 : f32
    %113 = vector.broadcast %cst_32 : f32 to vector<16x16xf32>
    %114 = arith.mulf %112, %113 : vector<16x16xf32>
    %cst_33 = arith.constant 0.000000e+00 : f32
    %115 = vector.broadcast %cst_33 : f32 to vector<16x16xf32>
    %116 = arith.maximumf %114, %115 : vector<16x16xf32>
    %117 = vector.broadcast %110 : vector<1x16xf32> to vector<16x16xf32>
    %118 = arith.mulf %117, %116 : vector<16x16xf32>
    %cst_34 = arith.constant 1.000000e+00 : f32
    %119 = vector.broadcast %cst_34 : f32 to vector<16x16xf32>
    %120 = arith.addf %105, %119 : vector<16x16xf32>
    %cst_35 = arith.constant 5.000000e-01 : f32
    %121 = vector.broadcast %cst_35 : f32 to vector<16x16xf32>
    %122 = arith.mulf %120, %121 : vector<16x16xf32>
    %cst_36 = arith.constant 0.000000e+00 : f32
    %123 = vector.broadcast %cst_36 : f32 to vector<16x16xf32>
    %124 = arith.maximumf %122, %123 : vector<16x16xf32>
    %125 = vector.broadcast %110 : vector<1x16xf32> to vector<16x16xf32>
    %126 = arith.mulf %125, %124 : vector<16x16xf32>
    %cst_37 = arith.constant dense<0.000000e+00> : vector<16xf32>
    %127 = vector.multi_reduction <add>, %118, %cst_37 [1] : vector<16x16xf32> to vector<16xf32>
    %128 = vector.shape_cast %127 : vector<16xf32> to vector<16x1xf32>
    %129 = tpu.reciprocal %128 {approx = true} : vector<16x1xf32> -> vector<16x1xf32>
    %130 = vector.broadcast %129 : vector<16x1xf32> to vector<16x16xf32>
    %131 = arith.mulf %118, %130 : vector<16x16xf32>
    %cst_38 = arith.constant dense<0.000000e+00> : vector<16xf32>
    %132 = vector.multi_reduction <add>, %126, %cst_38 [1] : vector<16x16xf32> to vector<16xf32>
    %133 = vector.shape_cast %132 : vector<16xf32> to vector<16x1xf32>
    %134 = tpu.reciprocal %133 {approx = true} : vector<16x1xf32> -> vector<16x1xf32>
    %135 = vector.broadcast %134 : vector<16x1xf32> to vector<16x16xf32>
    %136 = arith.mulf %126, %135 : vector<16x16xf32>
    %cst_39 = arith.constant 1.000000e-07 : f32
    %137 = vector.broadcast %cst_39 : f32 to vector<16x16xf32>
    %138 = arith.addf %136, %137 : vector<16x16xf32>
    %cst_40 = arith.constant 1.000000e-07 : f32
    %139 = vector.broadcast %cst_40 : f32 to vector<16x16xf32>
    %140 = arith.addf %131, %139 : vector<16x16xf32>
    %141 = tpu.reciprocal %140 {approx = true} : vector<16x16xf32> -> vector<16x16xf32>
    %142 = arith.mulf %138, %141 : vector<16x16xf32>
    %143 = math.log %142 : vector<16x16xf32>
    %144 = arith.mulf %136, %143 : vector<16x16xf32>
    %145 = vector.broadcast %8 : vector<16x1xf32> to vector<16x16xf32>
    %146 = arith.mulf %145, %144 : vector<16x16xf32>
    %147 = vector.shape_cast %146 : vector<16x16xf32> to vector<1x16x16xf32>
    %cst_41 = arith.constant dense<0.000000e+00> : vector<1xf32>
    %148 = vector.multi_reduction <add>, %147, %cst_41 [1, 2] : vector<1x16x16xf32> to vector<1xf32>
    %149 = vector.shape_cast %148 : vector<1xf32> to vector<1x1x1xf32>
    %150 = vector.extract %149[0, 0, 0] : f32 from vector<1x1x1xf32>
    %151 = tpu.iota {dimensions = array<i32: 0>} : vector<8x128xi32>
    %152 = tpu.iota {dimensions = array<i32: 1>} : vector<8x128xi32>
    %c0_i32 = arith.constant 0 : i32
    %153 = vector.broadcast %c0_i32 : i32 to vector<8x128xi32>
    %154 = arith.cmpi eq, %152, %153 : vector<8x128xi32>
    %c1_i32 = arith.constant 1 : i32
    %155 = vector.broadcast %c1_i32 : i32 to vector<8x128xi32>
    %156 = arith.cmpi eq, %152, %155 : vector<8x128xi32>
    %c2_i32 = arith.constant 2 : i32
    %157 = vector.broadcast %c2_i32 : i32 to vector<8x128xi32>
    %158 = arith.cmpi eq, %152, %157 : vector<8x128xi32>
    %cst_42 = arith.constant 0.000000e+00 : f32
    %159 = vector.broadcast %150 : f32 to vector<8x128xf32>
    %160 = vector.broadcast %cst_42 : f32 to vector<8x128xf32>
    %161 = arith.select %158, %159, %160 : vector<8x128xi1>, vector<8x128xf32>
    %162 = vector.broadcast %89 : f32 to vector<8x128xf32>
    %163 = arith.select %156, %162, %161 : vector<8x128xi1>, vector<8x128xf32>
    %164 = vector.broadcast %43 : f32 to vector<8x128xf32>
    %165 = arith.select %154, %164, %163 : vector<8x128xi1>, vector<8x128xf32>
    %c0_i32_43 = arith.constant 0 : i32
    %166 = vector.broadcast %c0_i32_43 : i32 to vector<8x128xi32>
    %167 = arith.cmpi eq, %151, %166 : vector<8x128xi32>
    %c1_i32_44 = arith.constant 1 : i32
    %168 = vector.broadcast %c1_i32_44 : i32 to vector<8x128xi32>
    %169 = arith.cmpi eq, %151, %168 : vector<8x128xi32>
    %c2_i32_45 = arith.constant 2 : i32
    %170 = vector.broadcast %c2_i32_45 : i32 to vector<8x128xi32>
    %171 = arith.cmpi eq, %151, %170 : vector<8x128xi32>
    %cst_46 = arith.constant 0.000000e+00 : f32
    %172 = vector.broadcast %cst_46 : f32 to vector<8x128xf32>
    %173 = arith.select %171, %165, %172 : vector<8x128xi1>, vector<8x128xf32>
    %174 = vector.shape_cast %97 : vector<1x128xf32> to vector<1x128xf32>
    %175 = vector.broadcast %174 : vector<1x128xf32> to vector<8x128xf32>
    %176 = arith.select %169, %175, %173 : vector<8x128xi1>, vector<8x128xf32>
    %177 = vector.shape_cast %93 : vector<1x128xf32> to vector<1x128xf32>
    %178 = vector.broadcast %177 : vector<1x128xf32> to vector<8x128xf32>
    %179 = arith.select %167, %178, %176 : vector<8x128xi1>, vector<8x128xf32>
    %c0_47 = arith.constant 0 : index
    %c0_48 = arith.constant 0 : index
    %c0_49 = arith.constant 0 : index
    %180 = vector.load %arg5[%c0_47, %c0_48, %c0_49] : memref<1x8x128xf32, #tpu.memory_space<vmem>>, vector<1x8x128xf32>
    %181 = vector.shape_cast %180 : vector<1x8x128xf32> to vector<8x128xf32>
    %182 = vector.shape_cast %179 : vector<8x128xf32> to vector<1x8x128xf32>
    tpu.vector_store %arg5[%c0_47, %c0_48, %c0_49], %182 {strides = array<i32>} : memref<1x8x128xf32, #tpu.memory_space<vmem>>, vector<1x8x128xf32>,
    return
  }
  func.func @transform_0(%arg0: i32) -> (i32, i32) {
    %c0_i32 = arith.constant 0 : i32
    %c0_i32_0 = arith.constant 0 : i32
    return %arg0, %c0_i32 : i32, i32
  }
  func.func @transform_1(%arg0: i32) -> (i32, i32) {
    %c0_i32 = arith.constant 0 : i32
    %c0_i32_0 = arith.constant 0 : i32
    return %arg0, %c0_i32 : i32, i32
  }
  func.func @transform_2(%arg0: i32) -> (i32, i32) {
    %c0_i32 = arith.constant 0 : i32
    %c0_i32_0 = arith.constant 0 : i32
    %c0_i32_1 = arith.constant 0 : i32
    return %c0_i32, %c0_i32_0 : i32, i32
  }
  func.func @transform_3(%arg0: i32) -> (i32, i32) {
    %c0_i32 = arith.constant 0 : i32
    %c0_i32_0 = arith.constant 0 : i32
    %c0_i32_1 = arith.constant 0 : i32
    return %c0_i32, %c0_i32_0 : i32, i32
  }
  func.func @transform_4(%arg0: i32) -> (i32, i32, i32) {
    %c0_i32 = arith.constant 0 : i32
    %c0_i32_0 = arith.constant 0 : i32
    %c0_i32_1 = arith.constant 0 : i32
    return %arg0, %c0_i32, %c0_i32_0 : i32, i32, i32
  }
  func.func @transform_5(%arg0: i32) -> (i32, i32) {
    %c0_i32 = arith.constant 0 : i32
    %c0_i32_0 = arith.constant 0 : i32
    return %arg0, %c0_i32 : i32, i32
  }
  func.func @transform_6(%arg0: i32) -> (i32, i32) {
    %c0_i32 = arith.constant 0 : i32
    %c0_i32_0 = arith.constant 0 : i32
    return %arg0, %c0_i32 : i32, i32
  }
}

</mosaic_0001>

<bundles_post_ra>
// kernel: tpu_custom_call.1
= control target key start
LH: loop header
LB: loop body
LE: loop exit
PB: predicated region body
PF: predicated region fallthrough
CT: control target
= control target key end

     0   :  { %12 = vsyncpa [#allocation3], 0  ;;  %s1012_s0 = inlined_call_operand.hbm [shape: f32[16,128], index: 0, kind: input, shape index: {}]   ;;  %s1013_s1 = inlined_call_operand.hbm [shape: f32[16,128], index: 1, kind: input, shape index: {}]   ;;  %s1014_s2 = inlined_call_operand.hbm [shape: bf16[16,128], index: 2, kind: input, shape index: {}]   ;;  %s1015_s3 = inlined_call_operand.vmem [shape: bf16[16,128], index: 3, kind: input, shape index: {}]   ;;  %s1016_s4 = inlined_call_operand.hbm [shape: f32[1,8,128], index: 4, kind: output, shape index: {0}]   ;;  %s1017_s5 = inlined_call_operand.hbm [shape: f32[16,128], index: 5, kind: output, shape index: {1}]   ;;  %s1018_s6 = inlined_call_operand.hbm [shape: f32[16,128], index: 6, kind: output, shape index: {2}]  }
   0x1   :  { %13 = vsyncpa [#allocation6], 0 }
   0x2   :  { %14 = vsyncpa [#allocation4], 0 }
   0x3   :  { %15 = vsyncpa [#allocation10], 0  ;;  %s750_s21 = smov [#allocation5]   ;;  %s751_s23 = smov [#allocation2]  }
   0x4   :  { %s33_s22 = sshll.u32 %s750_s21, 4  ;;  %s21_s24 = sshll.u32 %s751_s23, 4  ;;  %s34_s22 = int_to_ptr.vmem [resolvable:$true] %s33_s22  ;;  %s797_s24 = int_to_ptr.vmem [resolvable:$true] %s21_s24 }
   0x5   :  { %s610_s27 = scalar_lea.hbm %s1013_s1, 256 }
   0x6   :  { %p611_p0 = scmp.ne.s32.totalorder %s1013_s1, %s610_s27  ;;  %p614_p1 = scmp.lt.u32.totalorder %s610_s27, %s1013_s1 }
   0x8   :  { %p616_p2 = pnand %p614_p1, %p611_p0 }
   0xa   :  { %619 = shalt.err (!%p616_p2)
}
   0xb   :  { %s620_s8 = scalar_lea.vmem %s34_s22, 256  ;;  %p625_p4 = scmp.lt.s32.totalorder %s34_s22, %s34_s22 }
   0xc   :  { %p621_p3 = scmp.ne.s32.totalorder %s34_s22, %s620_s8  ;;  %p626_p5 = scmp.lt.s32.totalorder %s620_s8, %s620_s8 }
   0xe   :  { %p627_p6 = por %p626_p5, %p625_p4 }
  0x10   :  { %p628_p7 = pnand %p627_p6, %p621_p3 }
  0x12   :  { %631 = shalt.err (!%p628_p7)
}
  0x13   :  { %s752_s9 = smov 128   ;;  %s753_s10 = smov 8  }
  0x14   :  { %39 = dma.hbm_to_vmem [thread:$0]  %s1013_s1, 256, %s34_s22, [#allocation6], %s752_s9, %s752_s9, %s753_s10  }
  0x15   :  { %s632_s15 = scalar_lea.hbm %s1012_s0, 256 }
  0x16   :  { %p633_p8 = scmp.ne.s32.totalorder %s1012_s0, %s632_s15  ;;  %p636_p9 = scmp.lt.u32.totalorder %s632_s15, %s1012_s0 }
  0x18   :  { %p638_p10 = pnand %p636_p9, %p633_p8 }
  0x1a   :  { %641 = shalt.err (!%p638_p10)
}
  0x1b   :  { %s642_s20 = scalar_lea.vmem %s797_s24, 256  ;;  %p647_p12 = scmp.lt.s32.totalorder %s797_s24, %s797_s24 }
  0x1c   :  { %p643_p11 = scmp.ne.s32.totalorder %s797_s24, %s642_s20  ;;  %p648_p13 = scmp.lt.s32.totalorder %s642_s20, %s642_s20 }
  0x1e   :  { %p649_p0 = por %p648_p13, %p647_p12 }
  0x20   :  { %p650_p1 = pnand %p649_p0, %p643_p11 }
  0x22   :  { %653 = shalt.err (!%p650_p1)
}
  0x23   :  { %27 = dma.hbm_to_vmem [thread:$0]  %s1012_s0, 256, %s797_s24, [#allocation3], %s752_s9, %s752_s9, %s753_s10  }
  0x24   :  { %s754_s22 = smov [#allocation7]   ;;  %s654_s27 = scalar_lea.hbm %s1014_s2, 128 }
  0x25   :  { %s45_s23 = sshll.u32 %s754_s22, 4  ;;  %p655_p2 = scmp.ne.s32.totalorder %s1014_s2, %s654_s27  ;;  %s46_s23 = int_to_ptr.vmem [resolvable:$true] %s45_s23 }
  0x26   :  { %p658_p3 = scmp.lt.u32.totalorder %s654_s27, %s1014_s2 }
  0x28   :  { %p660_p4 = pnand %p658_p3, %p655_p2 }
  0x2a   :  { %663 = shalt.err (!%p660_p4)
}
  0x2b   :  { %s664_s8 = scalar_lea.vmem %s46_s23, 128  ;;  %p669_p6 = scmp.lt.s32.totalorder %s46_s23, %s46_s23 }
  0x2c   :  { %p665_p5 = scmp.ne.s32.totalorder %s46_s23, %s664_s8  ;;  %p670_p7 = scmp.lt.s32.totalorder %s664_s8, %s664_s8 }
  0x2e   :  { %p671_p8 = por %p670_p7, %p669_p6 }
  0x30   :  { %p672_p9 = pnand %p671_p8, %p665_p5 }
  0x32   :  { %675 = shalt.err (!%p672_p9)
}
  0x33   :  { %s755_s0 = smov 64   ;;  %s756_s24 = smov 4  }
  0x34   :  { %51 = dma.hbm_to_vmem [thread:$0]  %s1014_s2, 128, %s46_s23, [#allocation6], %s755_s0, %s755_s0, %s756_s24  }
  0x35   :  { %742 = dma.done.wait [#allocation3], 256  }
  0x36   :  { %743 = vsyncadd [#allocation3], 4294967040 }
  0x37   :  { %744 = dma.done.wait [#allocation6], 384  }
  0x38   :  { %745 = vsyncadd [#allocation6], 4294966912  ;;  %v757_v0 = vmov 0.0   ;;  %vm758_vm0 = vmmov 0   ;;  %v542_v1 = vld [vmem:[#allocation7] sm:$0xff]   ;;  %v78_v3 = vld [vmem:[#allocation2 + $0x8] sm:$0xff]  ;;  %v65_v15 = vlaneseq }
  0x39   :  { %510 = vmatprep.subr.bf16.mxu0 %v757_v0  ;;  %516 = vmatprep.subr.bf16.mxu1 %v757_v0  ;;  %v543_v2 = vld [vmem:[%s1015_s3] sm:$0xff]   ;;  %v80_v7 = vld [vmem:[#allocation5 + $0x8] sm:$0xff]  ;;  %v79_v8 = vld [vmem:[#allocation5] sm:$0xff]  ;;  %v148_v10 = vmul.f32 2.0, %v78_v3  ;;  %vm384_vm2 = vcmask 130048  }
  0x3a   :  { %512 = vmatprep.mubr.msk.bf16.mxu0 %vm758_vm0, %v757_v0  ;;  %518 = vmatprep.mubr.msk.bf16.mxu1 %vm758_vm0, %v757_v0  ;;  %v77_v4 = vld [vmem:[#allocation2] sm:$0xff]  ;;  %v856_v11 = vmul.f32 2.0, %v79_v8  ;;  %v174_v12 = vmul.f32 2.0, %v80_v7  ;;  %v862_v19 = vand.u32 127, %v65_v15 }
  0x3b   :  { %511 = vmatpush3.bf16.xpose.msra.mxu0 %v542_v1  ;;  %517 = vmatpush3.bf16.xpose.msra.mxu1 %v543_v2  ;;  %v544_v5 = vld [vmem:[#allocation7] sm:$0xff]   ;;  %v147_v9 = vmul.f32 2.0, %v77_v4 }
  0x3c   :  { %83 = vmax.xlane.f32.xlu0 %v78_v3  ;;  %81 = vmax.xlane.f32.xlu1 %v77_v4  ;;  %v545_v6 = vld [vmem:[%s1015_s3] sm:$0xff]   ;;  %vm263_vm1 = vcmp.lt.s32.totalorder %v862_v19, 12  ;;  %s759_s3 = smov [#allocation9]  }
  0x3d   :  { %v501_v42 = vsel %vm263_vm1, 1.0, %v757_v0  ;;  %s464_s16 = sshll.u32 %s759_s3, 4  ;;  %s465_s16 = int_to_ptr.vmem [resolvable:$true] %s464_s16 }
  0x3e   :  { %s676_s17 = scalar_lea.vmem %s465_s16, 256  ;;  %p681_p11 = scmp.lt.s32.totalorder %s465_s16, %s465_s16 }
  0x3f   :  { %p677_p10 = scmp.ne.s32.totalorder %s465_s16, %s676_s17  ;;  %p682_p12 = scmp.lt.s32.totalorder %s676_s17, %s676_s17 }
  0x40   :  { %107 = vmax.xlane.f32.xlu0 %v80_v7  ;;  %105 = vmax.xlane.f32.xlu1 %v79_v8 }
  0x41   :  { %p683_p13 = por %p682_p12, %p681_p11 }
  0x42   :  { %513 = vmatmul.mubr.bf16.vlgmr.msra.gmra.mrb[0].mxu0 %v544_v5  ;;  %519 = vmatmul.mubr.bf16.vlgmr.msra.gmra.mrb[0].mxu1 %v545_v6 }
  0x43   :  { %p684_p0 = pnand %p683_p13, %p677_p10 }
  0x44   :  { %149 = vmax.xlane.f32.xlu0 %v147_v9  ;;  %151 = vmax.xlane.f32.xlu1 %v148_v10 }
  0x48   :  { %175 = vmax.xlane.f32.xlu0 %v856_v11  ;;  %177 = vmax.xlane.f32.xlu1 %v174_v12 }
  0xc9   :  { %v84_v13 = vpop.xlane.xlu0 %83  ;;  %v82_v14 = vpop.xlane.xlu1 %81 }
  0xca   :  { %v864_v20 = vsub.f32 %v78_v3, %v84_v13  ;;  %v870_v30 = vsub.f32 %v77_v4, %v82_v14 }
  0xcc   :  { %v89_v33 = vmul.f32 1.442695, %v864_v20  ;;  %v87_v46 = vmul.f32 1.442695, %v870_v30 }
  0xcd   :  { %v108_v16 = vpop.xlane.xlu0 %107  ;;  %v106_v17 = vpop.xlane.xlu1 %105 }
  0xce   :  { %v859_v18 = vsub.f32 %v80_v7, %v108_v16  ;;  %v866_v23 = vsub.f32 %v79_v8, %v106_v17 }
  0xd0   :  { %v113_v27 = vmul.f32 1.442695, %v859_v18  ;;  %v111_v40 = vmul.f32 1.442695, %v866_v23 }
  0xd1   :  { %v150_v21 = vpop.xlane.xlu0 %149  ;;  %v152_v24 = vpop.xlane.xlu1 %151 }
  0xd2   :  { %546 = vpow2.f32 %v113_v27  ;;  %v875_v45 = vsub.f32 %v148_v10, %v152_v24  ;;  %v878_v52 = vsub.f32 %v147_v9, %v150_v21 }
  0xd3   :  { %548 = vpow2.f32 %v89_v33 }
  0xd4   :  { %550 = vpow2.f32 %v111_v40  ;;  %v157_v57 = vmul.f32 1.442695, %v875_v45  ;;  %v155_v62 = vmul.f32 1.442695, %v878_v52 }
  0xd5   :  { %v178_v49 = vpop.xlane.xlu1 %177  ;;  %v176_v55 = vpop.xlane.xlu0 %175  ;;  %552 = vpow2.f32 %v87_v46 }
  0xd6   :  { %v884_v59 = vsub.f32 %v174_v12, %v178_v49  ;;  %v893_v1 = vsub.f32 %v856_v11, %v176_v55  ;;  %554 = vpow2.f32 %v157_v57 }
  0xd7   :  { %556 = vpow2.f32 %v155_v62 }
  0xd8   :  { %v183_v2 = vmul.f32 1.442695, %v884_v59  ;;  %v181_v5 = vmul.f32 1.442695, %v893_v1 }
  0xda   :  { %558 = vpow2.f32 %v183_v2 }
  0xdb   :  { %560 = vpow2.f32 %v181_v5 }
  0xdc   :  { %v898_v4 = vpop.eup %546 }
  0xdd   :  { %v901_v6 = vpop.eup %548 }
  0xde   :  { %v903_v7 = vpop.eup %550 }
  0xdf   :  { %v906_v8 = vpop.eup %552 }
  0xe0   :  { %v910_v9 = vpop.eup %554 }
  0xe1   :  { %v913_v10 = vpop.eup %556 }
  0xe4   :  { %v916_v11 = vpop.eup %558 }
  0xe5   :  { %v919_v12 = vpop.eup %560 }
 0x115   :  { %v312_v22 = vpop.f32.mrb[0].mxu0  ;;  %v371_v28 = vpop.f32.mrb[0].mxu1 }
 0x116   :  { %v313_v25 = vadd.f32 1.0, %v312_v22  ;;  %v514_v26 = vpop.f32.mrb[1].mxu0  ;;  %v372_v31 = vadd.f32 1.0, %v371_v28  ;;  %v520_v32 = vpop.f32.mrb[1].mxu1 }
 0x117   :  { %v315_v29 = vpop.f32.mrb[2].mxu0  ;;  %v374_v37 = vpop.f32.mrb[2].mxu1 }
 0x118   :  { %v319_v34 = vmul.f32 0.5, %v313_v25  ;;  %v316_v35 = vadd.f32 1.0, %v315_v29  ;;  %v515_v36 = vpop.f32.mrb[3].mxu0  ;;  %v378_v38 = vmul.f32 0.5, %v372_v31  ;;  %v375_v39 = vadd.f32 1.0, %v374_v37  ;;  %v521_v41 = vpop.f32.mrb[3].mxu1 }
 0x119   :  { %v924_v37 = vshrl.u32 %v65_v15, 7 }
 0x11a   :  { %v321_v43 = vmax.f32 %v319_v34, 0.0  ;;  %v320_v44 = vmul.f32 0.5, %v316_v35  ;;  %v380_v47 = vmax.f32 %v378_v38, 0.0  ;;  %v379_v48 = vmul.f32 0.5, %v375_v39 }
 0x11c   :  { %v322_v50 = vmax.f32 %v320_v44, 0.0  ;;  %v323_v51 = vmul.f32 %v501_v42, %v321_v43  ;;  %v381_v53 = vmax.f32 %v379_v48, 0.0  ;;  %v880_v54 = vmul.f32 %v501_v42, %v380_v47 }
 0x11d   :  { %v67_v47 = vadd.s32 8, %v924_v37 }
 0x11e   :  { %v385_v56 = vsel %vm384_vm2, %v323_v51, 0.0  ;;  %v324_v58 = vmul.f32 %v501_v42, %v322_v50  ;;  %v886_v60 = vmul.f32 %v501_v42, %v381_v53  ;;  %v395_v63 = vsel %vm384_vm2, %v880_v54, 0.0 }
 0x11f   :  { %386 = vadd.xlane.f32.xlu1 %v385_v56  ;;  %vm72_vm3 = vcmp.lt.s32.totalorder %v67_v47, 12 }
 0x120   :  { %v388_v61 = vsel %vm384_vm2, %v324_v58, 0.0  ;;  %v398_v3 = vsel %vm384_vm2, %v886_v60, 0.0 }
 0x121   :  { %389 = vadd.xlane.f32.xlu0 %v388_v61 }
 0x123   :  { %396 = vadd.xlane.f32.xlu1 %v395_v63 }
 0x125   :  { %399 = vadd.xlane.f32.xlu0 %v398_v3 }
 0x127   :  { %117 = vadd.xlane.f32.xlu1 %v898_v4 }
 0x129   :  { %93 = vadd.xlane.f32.xlu0 %v901_v6 }
 0x12b   :  { %115 = vadd.xlane.f32.xlu1 %v903_v7 }
 0x12d   :  { %91 = vadd.xlane.f32.xlu0 %v906_v8 }
 0x12f   :  { %161 = vadd.xlane.f32.xlu1 %v910_v9 }
 0x131   :  { %159 = vadd.xlane.f32.xlu0 %v913_v10 }
 0x133   :  { %187 = vadd.xlane.f32.xlu1 %v916_v11 }
 0x135   :  { %185 = vadd.xlane.f32.xlu0 %v919_v12 }
 0x1ac   :  { %v387_v13 = vpop.xlane.xlu1 %386 }
 0x1ad   :  { %562 = vrcp.f32 %v387_v13  ;;  %v500_v13 = vsel %vm72_vm3, 1.0, %v757_v0 }
 0x1ae   :  { %v390_v14 = vpop.xlane.xlu0 %389 }
 0x1af   :  { %564 = vrcp.f32 %v390_v14 }
 0x1b0   :  { %v397_v16 = vpop.xlane.xlu1 %396 }
 0x1b1   :  { %566 = vrcp.f32 %v397_v16 }
 0x1b2   :  { %v400_v17 = vpop.xlane.xlu0 %399 }
 0x1b3   :  { %568 = vrcp.f32 %v400_v17 }
 0x1b4   :  { %v118_v21 = vpop.xlane.xlu1 %117 }
 0x1b5   :  { %570 = vrcp.f32 %v118_v21 }
 0x1b6   :  { %572 = vlog2.f32 %v118_v21  ;;  %v94_v22 = vpop.xlane.xlu0 %93 }
 0x1b7   :  { %v563_v24 = vpop.eup %562  ;;  %574 = vrcp.f32 %v94_v22 }
 0x1b8   :  { %v393_v25 = vmul.f32 %v563_v24, %v323_v51  ;;  %576 = vlog2.f32 %v94_v22  ;;  %v116_v26 = vpop.xlane.xlu1 %115 }
 0x1b9   :  { %v565_v27 = vpop.eup %564  ;;  %578 = vrcp.f32 %v116_v26 }
 0x1ba   :  { %v407_v28 = vadd.f32 1e-07, %v393_v25  ;;  %v394_v29 = vmul.f32 %v565_v27, %v324_v58  ;;  %580 = vlog2.f32 %v116_v26  ;;  %v92_v31 = vpop.xlane.xlu0 %91 }
 0x1bb   :  { %582 = vrcp.f32 %v92_v31  ;;  %v567_v34 = vpop.eup %566 }
 0x1bc   :  { %584 = vrcp.f32 %v407_v28  ;;  %v408_v32 = vadd.f32 1e-07, %v394_v29  ;;  %v162_v33 = vpop.xlane.xlu1 %161  ;;  %v927_v43 = vmul.f32 %v567_v34, %v880_v54 }
 0x1bd   :  { %586 = vlog2.f32 %v92_v31  ;;  %v569_v35 = vpop.eup %568 }
 0x1be   :  { %588 = vrcp.f32 %v408_v32  ;;  %v160_v36 = vpop.xlane.xlu0 %159  ;;  %v931_v15 = vmul.f32 %v569_v35, %v886_v60  ;;  %v405_v56 = vadd.f32 1e-07, %v927_v43 }
 0x1bf   :  { %v571_v38 = vpop.eup %570  ;;  %590 = vrcp.f32 %v162_v33 }
 0x1c0   :  { %v573_v39 = vpop.eup %572  ;;  %592 = vlog2.f32 %v162_v33  ;;  %v188_v40 = vpop.xlane.xlu1 %187  ;;  %v122_v61 = vmul.f32 %v571_v38, %v898_v4  ;;  %v406_v63 = vadd.f32 1e-07, %v931_v15 }
 0x1c1   :  { %v575_v41 = vpop.eup %574  ;;  %v126_v42 = vmul.f32 0.6931472, %v573_v39  ;;  %594 = vrcp.f32 %v160_v36 }
 0x1c2   :  { %v577_v44 = vpop.eup %576  ;;  %596 = vlog2.f32 %v160_v36  ;;  %v186_v46 = vpop.xlane.xlu0 %185  ;;  %v98_v51 = vmul.f32 %v575_v41, %v901_v6 }
 0x1c3   :  { %v579_v48 = vpop.eup %578  ;;  %v102_v49 = vmul.f32 0.6931472, %v577_v44  ;;  %598 = vrcp.f32 %v188_v40  ;;  %v128_v55 = vsub.f32 %v859_v18, %v126_v42 }
 0x1c4   :  { %v581_v50 = vpop.eup %580  ;;  %600 = vlog2.f32 %v188_v40  ;;  %v130_v6 = vsub.f32 %v98_v51, %v122_v61  ;;  %v120_v14 = vmul.f32 %v579_v48, %v903_v7 }
 0x1c5   :  { %v583_v53 = vpop.eup %582  ;;  %v104_v54 = vsub.f32 %v864_v20, %v102_v49  ;;  %602 = vrcp.f32 %v186_v46  ;;  %v124_v58 = vmul.f32 0.6931472, %v581_v50 }
 0x1c6   :  { %v585_v57 = vpop.eup %584  ;;  %604 = vlog2.f32 %v186_v46  ;;  %v96_v18 = vmul.f32 %v583_v53, %v906_v8 }
 0x1c7   :  { %v587_v60 = vpop.eup %586  ;;  %v132_v62 = vsub.f32 %v104_v54, %v128_v55  ;;  %v411_v2 = vmul.f32 %v585_v57, %v405_v56  ;;  %v127_v4 = vsub.f32 %v866_v23, %v124_v58 }
 0x1c8   :  { %v589_v3 = vpop.eup %588  ;;  %v100_v5 = vmul.f32 0.6931472, %v587_v60  ;;  %v129_v27 = vsub.f32 %v96_v18, %v120_v14 }
 0x1c9   :  { %v591_v20 = vpop.eup %590  ;;  %v412_v16 = vmul.f32 %v589_v3, %v406_v63  ;;  %606 = vlog2.f32 %v411_v2  ;;  %v134_v22 = vmul.f32 %v132_v62, %v130_v6 }
 0x1ca   :  { %v593_v17 = vpop.eup %592  ;;  %v103_v21 = vsub.f32 %v870_v30, %v100_v5  ;;  %v166_v24 = vmul.f32 %v591_v20, %v910_v9 }
 0x1cb   :  { %v595_v25 = vpop.eup %594  ;;  %v170_v26 = vmul.f32 0.6931472, %v593_v17  ;;  %608 = vlog2.f32 %v412_v16  ;;  %v136_v30 = vmul.f32 %v500_v13, %v134_v22 }
 0x1cc   :  { %v597_v8 = vpop.eup %596  ;;  %v131_v28 = vsub.f32 %v103_v21, %v127_v4  ;;  %v164_v0 = vmul.f32 %v595_v25, %v913_v10  ;;  %v204_v29 = vmul.f32 %v500_v13, %v166_v24  ;;  %200 = vst [vmem:[#allocation9 + $0x8] sm:$0xff] %v166_v24 }
 0x1cd   :  { %v599_v7 = vpop.eup %598  ;;  %v168_v31 = vmul.f32 0.6931472, %v597_v8  ;;  %v172_v32 = vsub.f32 %v875_v45, %v170_v26 }
 0x1ce   :  { %v601_v23 = vpop.eup %600  ;;  %v133_v33 = vmul.f32 %v131_v28, %v129_v27  ;;  %v947_v34 = vadd.f32 %v204_v29, %v164_v0  ;;  %199 = vst [vmem:[#allocation9] sm:$0xff] %v164_v0  ;;  %v192_v9 = vmul.f32 %v599_v7, %v916_v11 }
 0x1cf   :  { %v603_v35 = vpop.eup %602  ;;  %v196_v36 = vmul.f32 0.6931472, %v601_v23  ;;  %v171_v38 = vsub.f32 %v878_v52, %v168_v31  ;;  %v206_v44 = vmul.f32 %v204_v29, %v172_v32 }
 0x1d0   :  { %v605_v39 = vpop.eup %604  ;;  %v137_v10 = vadd.f32 %v136_v30, %v133_v33  ;;  %v190_v40 = vmul.f32 %v603_v35, %v919_v12  ;;  %v218_v41 = vmul.f32 %v500_v13, %v192_v9  ;;  %202 = vst [vmem:[#allocation11 + $0x8] sm:$0xff] %v192_v9 }
 0x1d1   :  { %v194_v42 = vmul.f32 0.6931472, %v605_v39  ;;  %v205_v45 = vmul.f32 %v171_v38, %v164_v0  ;;  %v198_v46 = vsub.f32 %v884_v59, %v196_v36 }
 0x1d2   :  { %138 = vadd.xlane.f32.xlu0 %v137_v10  ;;  %v953_v47 = vadd.f32 %v218_v41, %v190_v40  ;;  %201 = vst [vmem:[#allocation11] sm:$0xff] %v190_v40 }
 0x1d3   :  { %v607_v11 = vpop.eup %606  ;;  %v207_v48 = vadd.f32 %v206_v44, %v205_v45  ;;  %v197_v49 = vsub.f32 %v893_v1, %v194_v42  ;;  %v220_v12 = vmul.f32 %v218_v41, %v198_v46 }
 0x1d4   :  { %v414_v52 = vmul.f32 0.6931472, %v607_v11 }
 0x1d5   :  { %v609_v50 = vpop.eup %608  ;;  %208 = vadd.xlane.f32.xlu1 %v207_v48  ;;  %v219_v51 = vmul.f32 %v197_v49, %v190_v40 }
 0x1d6   :  { %v416_v53 = vmul.f32 0.6931472, %v609_v50  ;;  %v417_v54 = vmul.f32 %v414_v52, %v927_v43 }
 0x1d7   :  { %v221_v55 = vadd.f32 %v220_v12, %v219_v51 }
 0x1d8   :  { %v418_v56 = vmul.f32 %v416_v53, %v931_v15  ;;  %v421_v57 = vsel %vm384_vm2, %v417_v54, 0.0 }
 0x1d9   :  { %222 = vadd.xlane.f32.xlu0 %v221_v55 }
 0x1da   :  { %v420_v59 = vmul.f32 %v500_v13, %v418_v56 }
 0x1dc   :  { %v422_v58 = vsel %vm384_vm2, %v420_v59, 0.0 }
 0x1dd   :  { %v423_v61 = vadd.f32 %v422_v58, %v421_v57 }
 0x1df   :  { %424 = vadd.xlane.f32.xlu1 %v423_v61 }
 0x1e0   :  { %687 = shalt.err (!%p684_p0)
}
 0x1e1   :  { %s688_s20 = scalar_lea.hbm %s1017_s5, 256 }
 0x1e2   :  { %p689_p1 = scmp.ne.s32.totalorder %s1017_s5, %s688_s20  ;;  %p692_p2 = scmp.lt.u32.totalorder %s688_s20, %s1017_s5 }
 0x1e4   :  { %p694_p3 = pnand %p692_p2, %p689_p1 }
 0x1e6   :  { %697 = shalt.err (!%p694_p3)
}
 0x1e7   :  { %470 = dma.vmem_to_hbm [thread:$0]  %s465_s16, 256, %s1017_s5, [#allocation10], %s752_s9, %s752_s9, %s753_s10  }
 0x1e8   :  { %s760_s27 = smov [#allocation11]  }
 0x1e9   :  { %s476_s28 = sshll.u32 %s760_s27, 4  ;;  %s477_s28 = int_to_ptr.vmem [resolvable:$true] %s476_s28 }
 0x1ea   :  { %s698_s29 = scalar_lea.vmem %s477_s28, 256  ;;  %p703_p5 = scmp.lt.s32.totalorder %s477_s28, %s477_s28 }
 0x1eb   :  { %p699_p4 = scmp.ne.s32.totalorder %s477_s28, %s698_s29  ;;  %p704_p6 = scmp.lt.s32.totalorder %s698_s29, %s698_s29 }
 0x1ed   :  { %p705_p7 = por %p704_p6, %p703_p5 }
 0x1ef   :  { %p706_p8 = pnand %p705_p7, %p699_p4 }
 0x1f1   :  { %709 = shalt.err (!%p706_p8)
}
 0x1f2   :  { %s710_s8 = scalar_lea.hbm %s1018_s6, 256 }
 0x1f3   :  { %p711_p9 = scmp.ne.s32.totalorder %s1018_s6, %s710_s8  ;;  %p714_p10 = scmp.lt.u32.totalorder %s710_s8, %s1018_s6 }
 0x1f5   :  { %p716_p11 = pnand %p714_p10, %p711_p9 }
 0x1f7   :  { %719 = shalt.err (!%p716_p11)
}
 0x1f8   :  { %482 = dma.vmem_to_hbm [thread:$0]  %s477_s28, 256, %s1018_s6, [#allocation10], %s752_s9, %s752_s9, %s753_s10   ;;  %v241_v31 = vrot.slane %v953_v47, 4  ;;  %v234_v32 = vrot.slane %v947_v34, 4  ;;  %vm435_vm4 = vcmp.eq.s32.totalorder %v862_v19, 2  ;;  %vm434_vm5 = vcmp.eq.s32.totalorder %v862_v19, 1 }
 0x1f9   :  { %vm433_vm6 = vcmp.eq.s32.totalorder %v862_v19, 0  ;;  %vm444_vm7 = vcmp.eq.s32.totalorder %v924_v37, 2  ;;  %vm443_vm8 = vcmp.eq.s32.totalorder %v924_v37, 1  ;;  %s761_s3 = smov [#allocation8]   ;;  %vm442_vm9 = vcmp.eq.s32.totalorder %v924_v37, 0 }
 0x1fa   :  { %v242_v23 = vadd.f32 %v241_v31, %v953_v47  ;;  %v235_v33 = vadd.f32 %v234_v32, %v947_v34  ;;  %s455_s16 = sshll.u32 %s761_s3, 4  ;;  %s456_s16 = int_to_ptr.vmem [resolvable:$true] %s455_s16 }
 0x1fb   :  { %s720_s17 = scalar_lea.vmem %s456_s16, 128  ;;  %p725_p13 = scmp.lt.s32.totalorder %s456_s16, %s456_s16 }
 0x1fc   :  { %v243_v30 = vrot.slane %v242_v23, 2  ;;  %v236_v9 = vrot.slane %v235_v33, 2  ;;  %p721_p12 = scmp.ne.s32.totalorder %s456_s16, %s720_s17  ;;  %p726_p0 = scmp.lt.s32.totalorder %s720_s17, %s720_s17 }
 0x1fe   :  { %v244_v35 = vadd.f32 %v243_v30, %v242_v23  ;;  %v237_v36 = vadd.f32 %v236_v9, %v235_v33  ;;  %p727_p1 = por %p726_p0, %p725_p13 }
 0x200   :  { %v245_v38 = vrot.slane %v244_v35, 1  ;;  %v238_v10 = vrot.slane %v237_v36, 1  ;;  %p728_p2 = pnand %p727_p1, %p721_p12 }
 0x202   :  { %v246_v44 = vadd.f32 %v245_v38, %v244_v35  ;;  %v239_v47 = vadd.f32 %v238_v10, %v237_v36 }
 0x25f   :  { %v139_v1 = vpop.xlane.xlu0 %138 }
 0x260   :  { %v140_v43 = vrot.slane %v139_v1, 4 }
 0x262   :  { %v141_v15 = vadd.f32 %v140_v43, %v139_v1  ;;  %v209_v60 = vpop.xlane.xlu1 %208 }
 0x263   :  { %v210_v62 = vrot.slane %v209_v60, 4 }
 0x264   :  { %v142_v63 = vrot.slane %v141_v15, 2 }
 0x265   :  { %v211_v2 = vadd.f32 %v210_v62, %v209_v60 }
 0x266   :  { %v223_v3 = vpop.xlane.xlu0 %222  ;;  %v143_v5 = vadd.f32 %v142_v63, %v141_v15 }
 0x267   :  { %v212_v18 = vrot.slane %v211_v2, 2  ;;  %v224_v6 = vrot.slane %v223_v3, 4 }
 0x268   :  { %v144_v20 = vrot.slane %v143_v5, 1 }
 0x269   :  { %v225_v13 = vadd.f32 %v224_v6, %v223_v3  ;;  %v213_v14 = vadd.f32 %v212_v18, %v211_v2 }
 0x26a   :  { %v145_v16 = vadd.f32 %v144_v20, %v143_v5 }
 0x26b   :  { %v226_v17 = vrot.slane %v225_v13, 2  ;;  %v214_v4 = vrot.slane %v213_v14, 1 }
 0x26c   :  { %522 = vpush %v145_v16  ;;  %v425_v21 = vpop.xlane.xlu1 %424 }
 0x26d   :  { %v227_v22 = vadd.f32 %v226_v17, %v225_v13  ;;  %v426_v24 = vrot.slane %v425_v21, 4  ;;  %v215_v25 = vadd.f32 %v214_v4, %v213_v14 }
 0x26f   :  { %v427_v26 = vadd.f32 %v426_v24, %v425_v21  ;;  %524 = vpush %v215_v25  ;;  %v228_v8 = vrot.slane %v227_v22, 1 }
 0x271   :  { %v428_v27 = vrot.slane %v427_v26, 2  ;;  %v229_v28 = vadd.f32 %v228_v8, %v227_v22 }
 0x273   :  { %v429_v0 = vadd.f32 %v428_v27, %v427_v26  ;;  %526 = vpush %v229_v28 }
 0x275   :  { %v430_v29 = vrot.slane %v429_v0, 1 }
 0x277   :  { %v431_v7 = vadd.f32 %v430_v29, %v429_v0 }
 0x279   :  { %528 = vpush %v431_v7 }
 0x29d   :  { %s523_s6 = spop %522 }
 0x29e   :  { %v440_v41 = vstv %s523_s6 }
 0x2a0   :  { %s525_s9 = spop %524 }
 0x2a4   :  { %s527_s10 = spop %526 }
 0x2a5   :  { %s231_s14 = sadd.f32 %s527_s10, %s525_s9 }
 0x2a7   :  { %s232_s2 = ssub.f32 0.0, %s231_s14 }
 0x2a9   :  { %v438_v34 = vstv %s232_s2 }
 0x2aa   :  { %s529_s15 = spop %528 }
 0x2ab   :  { %v436_v39 = vstv %s529_s15 }
 0x2ac   :  { %v437_v40 = vsel %vm435_vm4, %v436_v39, 0.0 }
 0x2ad   :  { %v439_v42 = vsel %vm434_vm5, %v438_v34, %v437_v40 }
 0x2ae   :  { %v441_v45 = vsel %vm433_vm6, %v440_v41, %v439_v42 }
 0x2af   :  { %v445_v46 = vsel %vm444_vm7, %v441_v45, 0.0 }
 0x2b0   :  { %v446_v11 = vsel %vm443_vm8, %v246_v44, %v445_v46 }
 0x2b1   :  { %v447_v19 = vsel %vm442_vm9, %v239_v47, %v446_v11 }
 0x2b2   :  { %448 = vst [vmem:[#allocation8] sm:$0xff] %v447_v19 }
 0x2b3   :  { %731 = shalt.err (!%p728_p2)
}
 0x2b4   :  { %s732_s20 = scalar_lea.hbm %s1016_s4, 128 }
 0x2b5   :  { %p733_p3 = scmp.ne.s32.totalorder %s1016_s4, %s732_s20  ;;  %p736_p4 = scmp.lt.u32.totalorder %s732_s20, %s1016_s4 }
 0x2b7   :  { %p738_p5 = pnand %p736_p4, %p733_p3 }
 0x2b9   :  { %741 = shalt.err (!%p738_p5)
}
 0x2ba   :  { %458 = dma.vmem_to_hbm [thread:$0]  %s456_s16, 128, %s1016_s4, [#allocation4]  }
 0x2bb   :  { %746 = dma.done.wait [#allocation4], 128  }
 0x2bc   :  { %747 = vsyncadd [#allocation4], 4294967168 }
 0x2bd   :  { %748 = dma.done.wait [#allocation10], 512  }
 0x2be   :  { %749 = vsyncadd [#allocation10], 4294966784 }
 0x2bf   :  { %492 = vsyncpa [#allocation3], 1 }
 0x2c0   :  { %493 = vsyncpa [#allocation6], 1 }
 0x2c1   :  { %494 = vsyncpa [#allocation4], 1 }
 0x2c2   :  { %495 = vsyncpa [#allocation10], 1 }

// kernel: tpu_custom_call.1
= control target key start
LH: loop header
LB: loop body
LE: loop exit
PB: predicated region body
PF: predicated region fallthrough
CT: control target
= control target key end

     0   :  { %12 = vsyncpa [#allocation3], 0  ;;  %s1012_s0 = inlined_call_operand.hbm [shape: f32[16,128], index: 0, kind: input, shape index: {}]   ;;  %s1013_s1 = inlined_call_operand.hbm [shape: f32[16,128], index: 1, kind: input, shape index: {}]   ;;  %s1014_s2 = inlined_call_operand.hbm [shape: bf16[16,128], index: 2, kind: input, shape index: {}]   ;;  %s1015_s3 = inlined_call_operand.vmem [shape: bf16[16,128], index: 3, kind: input, shape index: {}]   ;;  %s1016_s4 = inlined_call_operand.hbm [shape: f32[1,8,128], index: 4, kind: output, shape index: {0}]   ;;  %s1017_s5 = inlined_call_operand.hbm [shape: f32[16,128], index: 5, kind: output, shape index: {1}]   ;;  %s1018_s6 = inlined_call_operand.hbm [shape: f32[16,128], index: 6, kind: output, shape index: {2}]  }
   0x1   :  { %13 = vsyncpa [#allocation6], 0 }
   0x2   :  { %14 = vsyncpa [#allocation4], 0 }
   0x3   :  { %15 = vsyncpa [#allocation10], 0  ;;  %s750_s21 = smov [#allocation5]   ;;  %s751_s23 = smov [#allocation2]  }
   0x4   :  { %s33_s22 = sshll.u32 %s750_s21, 4  ;;  %s21_s24 = sshll.u32 %s751_s23, 4  ;;  %s34_s22 = int_to_ptr.vmem [resolvable:$true] %s33_s22  ;;  %s797_s24 = int_to_ptr.vmem [resolvable:$true] %s21_s24 }
   0x5   :  { %s610_s27 = scalar_lea.hbm %s1013_s1, 256 }
   0x6   :  { %p611_p0 = scmp.ne.s32.totalorder %s1013_s1, %s610_s27  ;;  %p614_p1 = scmp.lt.u32.totalorder %s610_s27, %s1013_s1 }
   0x8   :  { %p616_p2 = pnand %p614_p1, %p611_p0 }
   0xa   :  { %619 = shalt.err (!%p616_p2)
}
   0xb   :  { %s620_s8 = scalar_lea.vmem %s34_s22, 256  ;;  %p625_p4 = scmp.lt.s32.totalorder %s34_s22, %s34_s22 }
   0xc   :  { %p621_p3 = scmp.ne.s32.totalorder %s34_s22, %s620_s8  ;;  %p626_p5 = scmp.lt.s32.totalorder %s620_s8, %s620_s8 }
   0xe   :  { %p627_p6 = por %p626_p5, %p625_p4 }
  0x10   :  { %p628_p7 = pnand %p627_p6, %p621_p3 }
  0x12   :  { %631 = shalt.err (!%p628_p7)
}
  0x13   :  { %s752_s9 = smov 128   ;;  %s753_s10 = smov 8  }
  0x14   :  { %39 = dma.hbm_to_vmem [thread:$0]  %s1013_s1, 256, %s34_s22, [#allocation6], %s752_s9, %s752_s9, %s753_s10  }
  0x15   :  { %s632_s15 = scalar_lea.hbm %s1012_s0, 256 }
  0x16   :  { %p633_p8 = scmp.ne.s32.totalorder %s1012_s0, %s632_s15  ;;  %p636_p9 = scmp.lt.u32.totalorder %s632_s15, %s1012_s0 }
  0x18   :  { %p638_p10 = pnand %p636_p9, %p633_p8 }
  0x1a   :  { %641 = shalt.err (!%p638_p10)
}
  0x1b   :  { %s642_s20 = scalar_lea.vmem %s797_s24, 256  ;;  %p647_p12 = scmp.lt.s32.totalorder %s797_s24, %s797_s24 }
  0x1c   :  { %p643_p11 = scmp.ne.s32.totalorder %s797_s24, %s642_s20  ;;  %p648_p13 = scmp.lt.s32.totalorder %s642_s20, %s642_s20 }
  0x1e   :  { %p649_p0 = por %p648_p13, %p647_p12 }
  0x20   :  { %p650_p1 = pnand %p649_p0, %p643_p11 }
  0x22   :  { %653 = shalt.err (!%p650_p1)
}
  0x23   :  { %27 = dma.hbm_to_vmem [thread:$0]  %s1012_s0, 256, %s797_s24, [#allocation3], %s752_s9, %s752_s9, %s753_s10  }
  0x24   :  { %s754_s22 = smov [#allocation7]   ;;  %s654_s27 = scalar_lea.hbm %s1014_s2, 128 }
  0x25   :  { %s45_s23 = sshll.u32 %s754_s22, 4  ;;  %p655_p2 = scmp.ne.s32.totalorder %s1014_s2, %s654_s27  ;;  %s46_s23 = int_to_ptr.vmem [resolvable:$true] %s45_s23 }
  0x26   :  { %p658_p3 = scmp.lt.u32.totalorder %s654_s27, %s1014_s2 }
  0x28   :  { %p660_p4 = pnand %p658_p3, %p655_p2 }
  0x2a   :  { %663 = shalt.err (!%p660_p4)
}
  0x2b   :  { %s664_s8 = scalar_lea.vmem %s46_s23, 128  ;;  %p669_p6 = scmp.lt.s32.totalorder %s46_s23, %s46_s23 }
  0x2c   :  { %p665_p5 = scmp.ne.s32.totalorder %s46_s23, %s664_s8  ;;  %p670_p7 = scmp.lt.s32.totalorder %s664_s8, %s664_s8 }
  0x2e   :  { %p671_p8 = por %p670_p7, %p669_p6 }
  0x30   :  { %p672_p9 = pnand %p671_p8, %p665_p5 }
  0x32   :  { %675 = shalt.err (!%p672_p9)
}
  0x33   :  { %s755_s0 = smov 64   ;;  %s756_s24 = smov 4  }
  0x34   :  { %51 = dma.hbm_to_vmem [thread:$0]  %s1014_s2, 128, %s46_s23, [#allocation6], %s755_s0, %s755_s0, %s756_s24  }
  0x35   :  { %742 = dma.done.wait [#allocation3], 256  }
  0x36   :  { %743 = vsyncadd [#allocation3], 4294967040 }
  0x37   :  { %744 = dma.done.wait [#allocation6], 384  }
  0x38   :  { %745 = vsyncadd [#allocation6], 4294966912  ;;  %v757_v0 = vmov 0.0   ;;  %vm758_vm0 = vmmov 0   ;;  %v542_v1 = vld [vmem:[#allocation7] sm:$0xff]   ;;  %v78_v3 = vld [vmem:[#allocation2 + $0x8] sm:$0xff]  ;;  %v65_v15 = vlaneseq }
  0x39   :  { %510 = vmatprep.subr.bf16.mxu0 %v757_v0  ;;  %516 = vmatprep.subr.bf16.mxu1 %v757_v0  ;;  %v543_v2 = vld [vmem:[%s1015_s3] sm:$0xff]   ;;  %v80_v7 = vld [vmem:[#allocation5 + $0x8] sm:$0xff]  ;;  %v79_v8 = vld [vmem:[#allocation5] sm:$0xff]  ;;  %v148_v10 = vmul.f32 2.0, %v78_v3  ;;  %vm384_vm2 = vcmask 130048  }
  0x3a   :  { %512 = vmatprep.mubr.msk.bf16.mxu0 %vm758_vm0, %v757_v0  ;;  %518 = vmatprep.mubr.msk.bf16.mxu1 %vm758_vm0, %v757_v0  ;;  %v77_v4 = vld [vmem:[#allocation2] sm:$0xff]  ;;  %v856_v11 = vmul.f32 2.0, %v79_v8  ;;  %v174_v12 = vmul.f32 2.0, %v80_v7  ;;  %v862_v19 = vand.u32 127, %v65_v15 }
  0x3b   :  { %511 = vmatpush3.bf16.xpose.msra.mxu0 %v542_v1  ;;  %517 = vmatpush3.bf16.xpose.msra.mxu1 %v543_v2  ;;  %v544_v5 = vld [vmem:[#allocation7] sm:$0xff]   ;;  %v147_v9 = vmul.f32 2.0, %v77_v4 }
  0x3c   :  { %83 = vmax.xlane.f32.xlu0 %v78_v3  ;;  %81 = vmax.xlane.f32.xlu1 %v77_v4  ;;  %v545_v6 = vld [vmem:[%s1015_s3] sm:$0xff]   ;;  %vm263_vm1 = vcmp.lt.s32.totalorder %v862_v19, 12  ;;  %s759_s3 = smov [#allocation9]  }
  0x3d   :  { %v501_v42 = vsel %vm263_vm1, 1.0, %v757_v0  ;;  %s464_s16 = sshll.u32 %s759_s3, 4  ;;  %s465_s16 = int_to_ptr.vmem [resolvable:$true] %s464_s16 }
  0x3e   :  { %s676_s17 = scalar_lea.vmem %s465_s16, 256  ;;  %p681_p11 = scmp.lt.s32.totalorder %s465_s16, %s465_s16 }
  0x3f   :  { %p677_p10 = scmp.ne.s32.totalorder %s465_s16, %s676_s17  ;;  %p682_p12 = scmp.lt.s32.totalorder %s676_s17, %s676_s17 }
  0x40   :  { %107 = vmax.xlane.f32.xlu0 %v80_v7  ;;  %105 = vmax.xlane.f32.xlu1 %v79_v8 }
  0x41   :  { %p683_p13 = por %p682_p12, %p681_p11 }
  0x42   :  { %513 = vmatmul.mubr.bf16.vlgmr.msra.gmra.mrb[0].mxu0 %v544_v5  ;;  %519 = vmatmul.mubr.bf16.vlgmr.msra.gmra.mrb[0].mxu1 %v545_v6 }
  0x43   :  { %p684_p0 = pnand %p683_p13, %p677_p10 }
  0x44   :  { %149 = vmax.xlane.f32.xlu0 %v147_v9  ;;  %151 = vmax.xlane.f32.xlu1 %v148_v10 }
  0x48   :  { %175 = vmax.xlane.f32.xlu0 %v856_v11  ;;  %177 = vmax.xlane.f32.xlu1 %v174_v12 }
  0xc9   :  { %v84_v13 = vpop.xlane.xlu0 %83  ;;  %v82_v14 = vpop.xlane.xlu1 %81 }
  0xca   :  { %v864_v20 = vsub.f32 %v78_v3, %v84_v13  ;;  %v870_v30 = vsub.f32 %v77_v4, %v82_v14 }
  0xcc   :  { %v89_v33 = vmul.f32 1.442695, %v864_v20  ;;  %v87_v46 = vmul.f32 1.442695, %v870_v30 }
  0xcd   :  { %v108_v16 = vpop.xlane.xlu0 %107  ;;  %v106_v17 = vpop.xlane.xlu1 %105 }
  0xce   :  { %v859_v18 = vsub.f32 %v80_v7, %v108_v16  ;;  %v866_v23 = vsub.f32 %v79_v8, %v106_v17 }
  0xd0   :  { %v113_v27 = vmul.f32 1.442695, %v859_v18  ;;  %v111_v40 = vmul.f32 1.442695, %v866_v23 }
  0xd1   :  { %v150_v21 = vpop.xlane.xlu0 %149  ;;  %v152_v24 = vpop.xlane.xlu1 %151 }
  0xd2   :  { %546 = vpow2.f32 %v113_v27  ;;  %v875_v45 = vsub.f32 %v148_v10, %v152_v24  ;;  %v878_v52 = vsub.f32 %v147_v9, %v150_v21 }
  0xd3   :  { %548 = vpow2.f32 %v89_v33 }
  0xd4   :  { %550 = vpow2.f32 %v111_v40  ;;  %v157_v57 = vmul.f32 1.442695, %v875_v45  ;;  %v155_v62 = vmul.f32 1.442695, %v878_v52 }
  0xd5   :  { %v178_v49 = vpop.xlane.xlu1 %177  ;;  %v176_v55 = vpop.xlane.xlu0 %175  ;;  %552 = vpow2.f32 %v87_v46 }
  0xd6   :  { %v884_v59 = vsub.f32 %v174_v12, %v178_v49  ;;  %v893_v1 = vsub.f32 %v856_v11, %v176_v55  ;;  %554 = vpow2.f32 %v157_v57 }
  0xd7   :  { %556 = vpow2.f32 %v155_v62 }
  0xd8   :  { %v183_v2 = vmul.f32 1.442695, %v884_v59  ;;  %v181_v5 = vmul.f32 1.442695, %v893_v1 }
  0xda   :  { %558 = vpow2.f32 %v183_v2 }
  0xdb   :  { %560 = vpow2.f32 %v181_v5 }
  0xdc   :  { %v898_v4 = vpop.eup %546 }
  0xdd   :  { %v901_v6 = vpop.eup %548 }
  0xde   :  { %v903_v7 = vpop.eup %550 }
  0xdf   :  { %v906_v8 = vpop.eup %552 }
  0xe0   :  { %v910_v9 = vpop.eup %554 }
  0xe1   :  { %v913_v10 = vpop.eup %556 }
  0xe4   :  { %v916_v11 = vpop.eup %558 }
  0xe5   :  { %v919_v12 = vpop.eup %560 }
 0x115   :  { %v312_v22 = vpop.f32.mrb[0].mxu0  ;;  %v371_v28 = vpop.f32.mrb[0].mxu1 }
 0x116   :  { %v313_v25 = vadd.f32 1.0, %v312_v22  ;;  %v514_v26 = vpop.f32.mrb[1].mxu0  ;;  %v372_v31 = vadd.f32 1.0, %v371_v28  ;;  %v520_v32 = vpop.f32.mrb[1].mxu1 }
 0x117   :  { %v315_v29 = vpop.f32.mrb[2].mxu0  ;;  %v374_v37 = vpop.f32.mrb[2].mxu1 }
 0x118   :  { %v319_v34 = vmul.f32 0.5, %v313_v25  ;;  %v316_v35 = vadd.f32 1.0, %v315_v29  ;;  %v515_v36 = vpop.f32.mrb[3].mxu0  ;;  %v378_v38 = vmul.f32 0.5, %v372_v31  ;;  %v375_v39 = vadd.f32 1.0, %v374_v37  ;;  %v521_v41 = vpop.f32.mrb[3].mxu1 }
 0x119   :  { %v924_v37 = vshrl.u32 %v65_v15, 7 }
 0x11a   :  { %v321_v43 = vmax.f32 %v319_v34, 0.0  ;;  %v320_v44 = vmul.f32 0.5, %v316_v35  ;;  %v380_v47 = vmax.f32 %v378_v38, 0.0  ;;  %v379_v48 = vmul.f32 0.5, %v375_v39 }
 0x11c   :  { %v322_v50 = vmax.f32 %v320_v44, 0.0  ;;  %v323_v51 = vmul.f32 %v501_v42, %v321_v43  ;;  %v381_v53 = vmax.f32 %v379_v48, 0.0  ;;  %v880_v54 = vmul.f32 %v501_v42, %v380_v47 }
 0x11d   :  { %v67_v47 = vadd.s32 8, %v924_v37 }
 0x11e   :  { %v385_v56 = vsel %vm384_vm2, %v323_v51, 0.0  ;;  %v324_v58 = vmul.f32 %v501_v42, %v322_v50  ;;  %v886_v60 = vmul.f32 %v501_v42, %v381_v53  ;;  %v395_v63 = vsel %vm384_vm2, %v880_v54, 0.0 }
 0x11f   :  { %386 = vadd.xlane.f32.xlu1 %v385_v56  ;;  %vm72_vm3 = vcmp.lt.s32.totalorder %v67_v47, 12 }
 0x120   :  { %v388_v61 = vsel %vm384_vm2, %v324_v58, 0.0  ;;  %v398_v3 = vsel %vm384_vm2, %v886_v60, 0.0 }
 0x121   :  { %389 = vadd.xlane.f32.xlu0 %v388_v61 }
 0x123   :  { %396 = vadd.xlane.f32.xlu1 %v395_v63 }
 0x125   :  { %399 = vadd.xlane.f32.xlu0 %v398_v3 }
 0x127   :  { %117 = vadd.xlane.f32.xlu1 %v898_v4 }
 0x129   :  { %93 = vadd.xlane.f32.xlu0 %v901_v6 }
 0x12b   :  { %115 = vadd.xlane.f32.xlu1 %v903_v7 }
 0x12d   :  { %91 = vadd.xlane.f32.xlu0 %v906_v8 }
 0x12f   :  { %161 = vadd.xlane.f32.xlu1 %v910_v9 }
 0x131   :  { %159 = vadd.xlane.f32.xlu0 %v913_v10 }
 0x133   :  { %187 = vadd.xlane.f32.xlu1 %v916_v11 }
 0x135   :  { %185 = vadd.xlane.f32.xlu0 %v919_v12 }
 0x1ac   :  { %v387_v13 = vpop.xlane.xlu1 %386 }
 0x1ad   :  { %562 = vrcp.f32 %v387_v13  ;;  %v500_v13 = vsel %vm72_vm3, 1.0, %v757_v0 }
 0x1ae   :  { %v390_v14 = vpop.xlane.xlu0 %389 }
 0x1af   :  { %564 = vrcp.f32 %v390_v14 }
 0x1b0   :  { %v397_v16 = vpop.xlane.xlu1 %396 }
 0x1b1   :  { %566 = vrcp.f32 %v397_v16 }
 0x1b2   :  { %v400_v17 = vpop.xlane.xlu0 %399 }
 0x1b3   :  { %568 = vrcp.f32 %v400_v17 }
 0x1b4   :  { %v118_v21 = vpop.xlane.xlu1 %117 }
 0x1b5   :  { %570 = vrcp.f32 %v118_v21 }
 0x1b6   :  { %572 = vlog2.f32 %v118_v21  ;;  %v94_v22 = vpop.xlane.xlu0 %93 }
 0x1b7   :  { %v563_v24 = vpop.eup %562  ;;  %574 = vrcp.f32 %v94_v22 }
 0x1b8   :  { %v393_v25 = vmul.f32 %v563_v24, %v323_v51  ;;  %576 = vlog2.f32 %v94_v22  ;;  %v116_v26 = vpop.xlane.xlu1 %115 }
 0x1b9   :  { %v565_v27 = vpop.eup %564  ;;  %578 = vrcp.f32 %v116_v26 }
 0x1ba   :  { %v407_v28 = vadd.f32 1e-07, %v393_v25  ;;  %v394_v29 = vmul.f32 %v565_v27, %v324_v58  ;;  %580 = vlog2.f32 %v116_v26  ;;  %v92_v31 = vpop.xlane.xlu0 %91 }
 0x1bb   :  { %582 = vrcp.f32 %v92_v31  ;;  %v567_v34 = vpop.eup %566 }
 0x1bc   :  { %584 = vrcp.f32 %v407_v28  ;;  %v408_v32 = vadd.f32 1e-07, %v394_v29  ;;  %v162_v33 = vpop.xlane.xlu1 %161  ;;  %v927_v43 = vmul.f32 %v567_v34, %v880_v54 }
 0x1bd   :  { %586 = vlog2.f32 %v92_v31  ;;  %v569_v35 = vpop.eup %568 }
 0x1be   :  { %588 = vrcp.f32 %v408_v32  ;;  %v160_v36 = vpop.xlane.xlu0 %159  ;;  %v931_v15 = vmul.f32 %v569_v35, %v886_v60  ;;  %v405_v56 = vadd.f32 1e-07, %v927_v43 }
 0x1bf   :  { %v571_v38 = vpop.eup %570  ;;  %590 = vrcp.f32 %v162_v33 }
 0x1c0   :  { %v573_v39 = vpop.eup %572  ;;  %592 = vlog2.f32 %v162_v33  ;;  %v188_v40 = vpop.xlane.xlu1 %187  ;;  %v122_v61 = vmul.f32 %v571_v38, %v898_v4  ;;  %v406_v63 = vadd.f32 1e-07, %v931_v15 }
 0x1c1   :  { %v575_v41 = vpop.eup %574  ;;  %v126_v42 = vmul.f32 0.6931472, %v573_v39  ;;  %594 = vrcp.f32 %v160_v36 }
 0x1c2   :  { %v577_v44 = vpop.eup %576  ;;  %596 = vlog2.f32 %v160_v36  ;;  %v186_v46 = vpop.xlane.xlu0 %185  ;;  %v98_v51 = vmul.f32 %v575_v41, %v901_v6 }
 0x1c3   :  { %v579_v48 = vpop.eup %578  ;;  %v102_v49 = vmul.f32 0.6931472, %v577_v44  ;;  %598 = vrcp.f32 %v188_v40  ;;  %v128_v55 = vsub.f32 %v859_v18, %v126_v42 }
 0x1c4   :  { %v581_v50 = vpop.eup %580  ;;  %600 = vlog2.f32 %v188_v40  ;;  %v130_v6 = vsub.f32 %v98_v51, %v122_v61  ;;  %v120_v14 = vmul.f32 %v579_v48, %v903_v7 }
 0x1c5   :  { %v583_v53 = vpop.eup %582  ;;  %v104_v54 = vsub.f32 %v864_v20, %v102_v49  ;;  %602 = vrcp.f32 %v186_v46  ;;  %v124_v58 = vmul.f32 0.6931472, %v581_v50 }
 0x1c6   :  { %v585_v57 = vpop.eup %584  ;;  %604 = vlog2.f32 %v186_v46  ;;  %v96_v18 = vmul.f32 %v583_v53, %v906_v8 }
 0x1c7   :  { %v587_v60 = vpop.eup %586  ;;  %v132_v62 = vsub.f32 %v104_v54, %v128_v55  ;;  %v411_v2 = vmul.f32 %v585_v57, %v405_v56  ;;  %v127_v4 = vsub.f32 %v866_v23, %v124_v58 }
 0x1c8   :  { %v589_v3 = vpop.eup %588  ;;  %v100_v5 = vmul.f32 0.6931472, %v587_v60  ;;  %v129_v27 = vsub.f32 %v96_v18, %v120_v14 }
 0x1c9   :  { %v591_v20 = vpop.eup %590  ;;  %v412_v16 = vmul.f32 %v589_v3, %v406_v63  ;;  %606 = vlog2.f32 %v411_v2  ;;  %v134_v22 = vmul.f32 %v132_v62, %v130_v6 }
 0x1ca   :  { %v593_v17 = vpop.eup %592  ;;  %v103_v21 = vsub.f32 %v870_v30, %v100_v5  ;;  %v166_v24 = vmul.f32 %v591_v20, %v910_v9 }
 0x1cb   :  { %v595_v25 = vpop.eup %594  ;;  %v170_v26 = vmul.f32 0.6931472, %v593_v17  ;;  %608 = vlog2.f32 %v412_v16  ;;  %v136_v30 = vmul.f32 %v500_v13, %v134_v22 }
 0x1cc   :  { %v597_v8 = vpop.eup %596  ;;  %v131_v28 = vsub.f32 %v103_v21, %v127_v4  ;;  %v164_v0 = vmul.f32 %v595_v25, %v913_v10  ;;  %v204_v29 = vmul.f32 %v500_v13, %v166_v24  ;;  %200 = vst [vmem:[#allocation9 + $0x8] sm:$0xff] %v166_v24 }
 0x1cd   :  { %v599_v7 = vpop.eup %598  ;;  %v168_v31 = vmul.f32 0.6931472, %v597_v8  ;;  %v172_v32 = vsub.f32 %v875_v45, %v170_v26 }
 0x1ce   :  { %v601_v23 = vpop.eup %600  ;;  %v133_v33 = vmul.f32 %v131_v28, %v129_v27  ;;  %v947_v34 = vadd.f32 %v204_v29, %v164_v0  ;;  %199 = vst [vmem:[#allocation9] sm:$0xff] %v164_v0  ;;  %v192_v9 = vmul.f32 %v599_v7, %v916_v11 }
 0x1cf   :  { %v603_v35 = vpop.eup %602  ;;  %v196_v36 = vmul.f32 0.6931472, %v601_v23  ;;  %v171_v38 = vsub.f32 %v878_v52, %v168_v31  ;;  %v206_v44 = vmul.f32 %v204_v29, %v172_v32 }
 0x1d0   :  { %v605_v39 = vpop.eup %604  ;;  %v137_v10 = vadd.f32 %v136_v30, %v133_v33  ;;  %v190_v40 = vmul.f32 %v603_v35, %v919_v12  ;;  %v218_v41 = vmul.f32 %v500_v13, %v192_v9  ;;  %202 = vst [vmem:[#allocation11 + $0x8] sm:$0xff] %v192_v9 }
 0x1d1   :  { %v194_v42 = vmul.f32 0.6931472, %v605_v39  ;;  %v205_v45 = vmul.f32 %v171_v38, %v164_v0  ;;  %v198_v46 = vsub.f32 %v884_v59, %v196_v36 }
 0x1d2   :  { %138 = vadd.xlane.f32.xlu0 %v137_v10  ;;  %v953_v47 = vadd.f32 %v218_v41, %v190_v40  ;;  %201 = vst [vmem:[#allocation11] sm:$0xff] %v190_v40 }
 0x1d3   :  { %v607_v11 = vpop.eup %606  ;;  %v207_v48 = vadd.f32 %v206_v44, %v205_v45  ;;  %v197_v49 = vsub.f32 %v893_v1, %v194_v42  ;;  %v220_v12 = vmul.f32 %v218_v41, %v198_v46 }
 0x1d4   :  { %v414_v52 = vmul.f32 0.6931472, %v607_v11 }
 0x1d5   :  { %v609_v50 = vpop.eup %608  ;;  %208 = vadd.xlane.f32.xlu1 %v207_v48  ;;  %v219_v51 = vmul.f32 %v197_v49, %v190_v40 }
 0x1d6   :  { %v416_v53 = vmul.f32 0.6931472, %v609_v50  ;;  %v417_v54 = vmul.f32 %v414_v52, %v927_v43 }
 0x1d7   :  { %v221_v55 = vadd.f32 %v220_v12, %v219_v51 }
 0x1d8   :  { %v418_v56 = vmul.f32 %v416_v53, %v931_v15  ;;  %v421_v57 = vsel %vm384_vm2, %v417_v54, 0.0 }
 0x1d9   :  { %222 = vadd.xlane.f32.xlu0 %v221_v55 }
 0x1da   :  { %v420_v59 = vmul.f32 %v500_v13, %v418_v56 }
 0x1dc   :  { %v422_v58 = vsel %vm384_vm2, %v420_v59, 0.0 }
 0x1dd   :  { %v423_v61 = vadd.f32 %v422_v58, %v421_v57 }
 0x1df   :  { %424 = vadd.xlane.f32.xlu1 %v423_v61 }
 0x1e0   :  { %687 = shalt.err (!%p684_p0)
}
 0x1e1   :  { %s688_s20 = scalar_lea.hbm %s1017_s5, 256 }
 0x1e2   :  { %p689_p1 = scmp.ne.s32.totalorder %s1017_s5, %s688_s20  ;;  %p692_p2 = scmp.lt.u32.totalorder %s688_s20, %s1017_s5 }
 0x1e4   :  { %p694_p3 = pnand %p692_p2, %p689_p1 }
 0x1e6   :  { %697 = shalt.err (!%p694_p3)
}
 0x1e7   :  { %470 = dma.vmem_to_hbm [thread:$0]  %s465_s16, 256, %s1017_s5, [#allocation10], %s752_s9, %s752_s9, %s753_s10  }
 0x1e8   :  { %s760_s27 = smov [#allocation11]  }
 0x1e9   :  { %s476_s28 = sshll.u32 %s760_s27, 4  ;;  %s477_s28 = int_to_ptr.vmem [resolvable:$true] %s476_s28 }
 0x1ea   :  { %s698_s29 = scalar_lea.vmem %s477_s28, 256  ;;  %p703_p5 = scmp.lt.s32.totalorder %s477_s28, %s477_s28 }
 0x1eb   :  { %p699_p4 = scmp.ne.s32.totalorder %s477_s28, %s698_s29  ;;  %p704_p6 = scmp.lt.s32.totalorder %s698_s29, %s698_s29 }
 0x1ed   :  { %p705_p7 = por %p704_p6, %p703_p5 }
 0x1ef   :  { %p706_p8 = pnand %p705_p7, %p699_p4 }
 0x1f1   :  { %709 = shalt.err (!%p706_p8)
}
 0x1f2   :  { %s710_s8 = scalar_lea.hbm %s1018_s6, 256 }
 0x1f3   :  { %p711_p9 = scmp.ne.s32.totalorder %s1018_s6, %s710_s8  ;;  %p714_p10 = scmp.lt.u32.totalorder %s710_s8, %s1018_s6 }
 0x1f5   :  { %p716_p11 = pnand %p714_p10, %p711_p9 }
 0x1f7   :  { %719 = shalt.err (!%p716_p11)
}
 0x1f8   :  { %482 = dma.vmem_to_hbm [thread:$0]  %s477_s28, 256, %s1018_s6, [#allocation10], %s752_s9, %s752_s9, %s753_s10   ;;  %v241_v31 = vrot.slane %v953_v47, 4  ;;  %v234_v32 = vrot.slane %v947_v34, 4  ;;  %vm435_vm4 = vcmp.eq.s32.totalorder %v862_v19, 2  ;;  %vm434_vm5 = vcmp.eq.s32.totalorder %v862_v19, 1 }
 0x1f9   :  { %vm433_vm6 = vcmp.eq.s32.totalorder %v862_v19, 0  ;;  %vm444_vm7 = vcmp.eq.s32.totalorder %v924_v37, 2  ;;  %vm443_vm8 = vcmp.eq.s32.totalorder %v924_v37, 1  ;;  %s761_s3 = smov [#allocation8]   ;;  %vm442_vm9 = vcmp.eq.s32.totalorder %v924_v37, 0 }
 0x1fa   :  { %v242_v23 = vadd.f32 %v241_v31, %v953_v47  ;;  %v235_v33 = vadd.f32 %v234_v32, %v947_v34  ;;  %s455_s16 = sshll.u32 %s761_s3, 4  ;;  %s456_s16 = int_to_ptr.vmem [resolvable:$true] %s455_s16 }
 0x1fb   :  { %s720_s17 = scalar_lea.vmem %s456_s16, 128  ;;  %p725_p13 = scmp.lt.s32.totalorder %s456_s16, %s456_s16 }
 0x1fc   :  { %v243_v30 = vrot.slane %v242_v23, 2  ;;  %v236_v9 = vrot.slane %v235_v33, 2  ;;  %p721_p12 = scmp.ne.s32.totalorder %s456_s16, %s720_s17  ;;  %p726_p0 = scmp.lt.s32.totalorder %s720_s17, %s720_s17 }
 0x1fe   :  { %v244_v35 = vadd.f32 %v243_v30, %v242_v23  ;;  %v237_v36 = vadd.f32 %v236_v9, %v235_v33  ;;  %p727_p1 = por %p726_p0, %p725_p13 }
 0x200   :  { %v245_v38 = vrot.slane %v244_v35, 1  ;;  %v238_v10 = vrot.slane %v237_v36, 1  ;;  %p728_p2 = pnand %p727_p1, %p721_p12 }
 0x202   :  { %v246_v44 = vadd.f32 %v245_v38, %v244_v35  ;;  %v239_v47 = vadd.f32 %v238_v10, %v237_v36 }
 0x25f   :  { %v139_v1 = vpop.xlane.xlu0 %138 }
 0x260   :  { %v140_v43 = vrot.slane %v139_v1, 4 }
 0x262   :  { %v141_v15 = vadd.f32 %v140_v43, %v139_v1  ;;  %v209_v60 = vpop.xlane.xlu1 %208 }
 0x263   :  { %v210_v62 = vrot.slane %v209_v60, 4 }
 0x264   :  { %v142_v63 = vrot.slane %v141_v15, 2 }
 0x265   :  { %v211_v2 = vadd.f32 %v210_v62, %v209_v60 }
 0x266   :  { %v223_v3 = vpop.xlane.xlu0 %222  ;;  %v143_v5 = vadd.f32 %v142_v63, %v141_v15 }
 0x267   :  { %v212_v18 = vrot.slane %v211_v2, 2  ;;  %v224_v6 = vrot.slane %v223_v3, 4 }
 0x268   :  { %v144_v20 = vrot.slane %v143_v5, 1 }
 0x269   :  { %v225_v13 = vadd.f32 %v224_v6, %v223_v3  ;;  %v213_v14 = vadd.f32 %v212_v18, %v211_v2 }
 0x26a   :  { %v145_v16 = vadd.f32 %v144_v20, %v143_v5 }
 0x26b   :  { %v226_v17 = vrot.slane %v225_v13, 2  ;;  %v214_v4 = vrot.slane %v213_v14, 1 }
 0x26c   :  { %522 = vpush %v145_v16  ;;  %v425_v21 = vpop.xlane.xlu1 %424 }
 0x26d   :  { %v227_v22 = vadd.f32 %v226_v17, %v225_v13  ;;  %v426_v24 = vrot.slane %v425_v21, 4  ;;  %v215_v25 = vadd.f32 %v214_v4, %v213_v14 }
 0x26f   :  { %v427_v26 = vadd.f32 %v426_v24, %v425_v21  ;;  %524 = vpush %v215_v25  ;;  %v228_v8 = vrot.slane %v227_v22, 1 }
 0x271   :  { %v428_v27 = vrot.slane %v427_v26, 2  ;;  %v229_v28 = vadd.f32 %v228_v8, %v227_v22 }
 0x273   :  { %v429_v0 = vadd.f32 %v428_v27, %v427_v26  ;;  %526 = vpush %v229_v28 }
 0x275   :  { %v430_v29 = vrot.slane %v429_v0, 1 }
 0x277   :  { %v431_v7 = vadd.f32 %v430_v29, %v429_v0 }
 0x279   :  { %528 = vpush %v431_v7 }
 0x29d   :  { %s523_s6 = spop %522 }
 0x29e   :  { %v440_v41 = vstv %s523_s6 }
 0x2a0   :  { %s525_s9 = spop %524 }
 0x2a4   :  { %s527_s10 = spop %526 }
 0x2a5   :  { %s231_s14 = sadd.f32 %s527_s10, %s525_s9 }
 0x2a7   :  { %s232_s2 = ssub.f32 0.0, %s231_s14 }
 0x2a9   :  { %v438_v34 = vstv %s232_s2 }
 0x2aa   :  { %s529_s15 = spop %528 }
 0x2ab   :  { %v436_v39 = vstv %s529_s15 }
 0x2ac   :  { %v437_v40 = vsel %vm435_vm4, %v436_v39, 0.0 }
 0x2ad   :  { %v439_v42 = vsel %vm434_vm5, %v438_v34, %v437_v40 }
 0x2ae   :  { %v441_v45 = vsel %vm433_vm6, %v440_v41, %v439_v42 }
 0x2af   :  { %v445_v46 = vsel %vm444_vm7, %v441_v45, 0.0 }
 0x2b0   :  { %v446_v11 = vsel %vm443_vm8, %v246_v44, %v445_v46 }
 0x2b1   :  { %v447_v19 = vsel %vm442_vm9, %v239_v47, %v446_v11 }
 0x2b2   :  { %448 = vst [vmem:[#allocation8] sm:$0xff] %v447_v19 }
 0x2b3   :  { %731 = shalt.err (!%p728_p2)
}
 0x2b4   :  { %s732_s20 = scalar_lea.hbm %s1016_s4, 128 }
 0x2b5   :  { %p733_p3 = scmp.ne.s32.totalorder %s1016_s4, %s732_s20  ;;  %p736_p4 = scmp.lt.u32.totalorder %s732_s20, %s1016_s4 }
 0x2b7   :  { %p738_p5 = pnand %p736_p4, %p733_p3 }
 0x2b9   :  { %741 = shalt.err (!%p738_p5)
}
 0x2ba   :  { %458 = dma.vmem_to_hbm [thread:$0]  %s456_s16, 128, %s1016_s4, [#allocation4]  }
 0x2bb   :  { %746 = dma.done.wait [#allocation4], 128  }
 0x2bc   :  { %747 = vsyncadd [#allocation4], 4294967168 }
 0x2bd   :  { %748 = dma.done.wait [#allocation10], 512  }
 0x2be   :  { %749 = vsyncadd [#allocation10], 4294966784 }
 0x2bf   :  { %492 = vsyncpa [#allocation3], 1 }
 0x2c0   :  { %493 = vsyncpa [#allocation6], 1 }
 0x2c1   :  { %494 = vsyncpa [#allocation4], 1 }
 0x2c2   :  { %495 = vsyncpa [#allocation10], 1 }

</bundles_post_ra>
